<compile_context>
chip_gen: v6e
topology: v6e:2x2x1
jax: 0.10.0
libtpu: 0.0.40
codegen_flags: <defaults>
</compile_context>

<pallas_src>
import jax
import jax.numpy as jnp
from jax.experimental import pallas as pl
from jax.experimental.pallas import tpu as pltpu


def robustnet_kernel(x_ref, wih0_ref, w0f_ref, whh1_ref, b0_ref, b1_ref,
                     wd_ref, bd_ref, label_ref, mask_ref,
                     negloss_ref, pred_ref):
    SBp, _ = x_ref.shape
    H = whh1_ref.shape[0]
    Bp = negloss_ref.shape[0]
    S = SBp // Bp
    H4 = 4 * H

    w0f = w0f_ref[...]           # (H, 8H)  bf16, [whh0 | wih1] fused
    whh1 = whh1_ref[...]         # (H, 4H)  bf16
    b1 = b1_ref[...]             # (1, 4H)  f32

    # ---- hoisted, non-recurrent prologue --------------------------------
    # Layer-0 input projection for every timestep in one MXU call; bias folded in.
    xproj = jnp.dot(x_ref[...], wih0_ref[...],
                    preferred_element_type=jnp.float32) + b0_ref[...]   # (S*Bp, 4H) f32
    b1b = jnp.broadcast_to(b1, (Bp, H4))                                # hoisted broadcast

    def lstm_gates(g, c):
        # Gate columns are pre-ordered (i, f, o | g) in the wrapper: one sigmoid pass over
        # the first 3H lanes and one tanh pass over the last H lanes (EUP work ~halved).
        sg = jax.nn.sigmoid(g[:, :3 * H])
        gg = jnp.tanh(g[:, 3 * H:])
        i = sg[:, 0 * H:1 * H]
        f = sg[:, 1 * H:2 * H]
        o = sg[:, 2 * H:3 * H]
        c_new = f * c + i * gg
        h_new = o * jnp.tanh(c_new)
        return h_new, c_new

    # ---- serial recurrence (fully unrolled; fused h0 matmul per step) ----
    zeros = jnp.zeros((Bp, H), jnp.float32)
    h0, c0, h1, c1 = zeros, zeros, zeros, zeros
    fused = jnp.zeros((Bp, 8 * H), jnp.float32)   # h0(-1) @ [whh0 | wih1] == 0
    h1_list = []
    for t in range(S):
        # g0(t) = xproj(t) + h0(t-1) @ whh0 (recurrent half of last step's fused matmul).
        if t == 0:
            g0 = xproj[0:Bp, :]
        else:
            g0 = xproj[t * Bp:(t + 1) * Bp, :] + fused[:, :H4]
        h0, c0 = lstm_gates(g0, c0)

        # One wide (Bp,H)x(H,8H) MXU call: whh0 half feeds g0(t+1), wih1 half feeds g1(t).
        fused = jnp.dot(h0.astype(jnp.bfloat16), w0f,
                        preferred_element_type=jnp.float32)             # (Bp, 8H)

        # h1(t-1) @ whh1 depends only on the previous step's h1 -> off the h0 chain.
        if t == 0:
            g1 = fused[:, H4:] + b1b
        else:
            rec1 = jnp.dot(h1.astype(jnp.bfloat16), whh1,
                           preferred_element_type=jnp.float32)          # (Bp, 4H)
            g1 = fused[:, H4:] + rec1 + b1b
        h1, c1 = lstm_gates(g1, c1)
        h1_list.append(h1)

    # ---- epilogue: decode matvec + logistic log-softmax + masked NLL ----
    h1_all = jnp.concatenate(h1_list, axis=0)                           # (S*Bp, H) f32
    d = jnp.dot(h1_all.astype(jnp.bfloat16), wd_ref[...],
                preferred_element_type=jnp.float32) + bd_ref[...]       # (S*Bp, 1) = dec1-dec0

    p1 = jax.nn.sigmoid(d)                                              # softmax[...,1]
    # Stable softplus(d); logp0 = -softplus(d), logp1 = d - softplus(d) = -softplus(-d).
    sp = jnp.maximum(d, 0.0) + jnp.log(1.0 + jnp.exp(-jnp.abs(d)))
    logp0 = -sp
    logp1 = d - sp

    lab = label_ref[...]                                                # (S*Bp, 2) f32
    msk = mask_ref[...]                                                 # (S*Bp, 1) f32
    per_row = (lab[:, 0:1] * logp0 + lab[:, 1:2] * logp1) * msk         # (S*Bp, 1)

    numer = per_row[0:Bp, :]
    denom = msk[0:Bp, :]
    for t in range(1, S):
        numer = numer + per_row[t * Bp:(t + 1) * Bp, :]
        denom = denom + msk[t * Bp:(t + 1) * Bp, :]
    denom = jnp.maximum(denom, 1e-6)                                    # guard fully-masked rows
    negloss_ref[...] = -(numer * pl.reciprocal(denom, approx=True))     # (Bp, 1)
    pred_ref[...] = p1                                                  # (S*Bp, 1), one slab store


def robustnet_forward(indices, label, mask, params, video_embeddings):
    B, S = indices.shape
    V, E = video_embeddings.shape
    H = params['whh0'].shape[1]
    Bp = ((B + 7) // 8) * 8                                             # sublane-pad batch

    def reorder(w):
        # PyTorch gate order (i, f, g, o) along the leading 4H axis -> (i, f, o, g).
        return jnp.concatenate([w[0:H], w[H:2 * H], w[3 * H:4 * H], w[2 * H:3 * H]], axis=0)

    # --- glue: embedding gather + sequence-major flatten + batch pad (plain JAX) ---
    # TODO(synk): fuse this gather into the kernel via scalar-prefetched indices at scale.
    x = video_embeddings[indices.reshape(-1)].reshape(B, S, E)
    x = jnp.transpose(x, (1, 0, 2))                                     # (S, B, E)
    lab = jnp.transpose(label, (1, 0, 2)).astype(jnp.float32)           # (S, B, 2)
    msk = jnp.transpose(mask, (1, 0))[..., None].astype(jnp.float32)    # (S, B, 1)
    pad = Bp - B
    if pad:
        x = jnp.pad(x, ((0, 0), (0, pad), (0, 0)))
        lab = jnp.pad(lab, ((0, 0), (0, pad), (0, 0)))
        msk = jnp.pad(msk, ((0, 0), (0, pad), (0, 0)))
    x2d = x.reshape(S * Bp, E).astype(jnp.bfloat16)                     # row = t*Bp + b
    lab2d = lab.reshape(S * Bp, 2)
    msk2d = msk.reshape(S * Bp, 1)

    # --- weight prep: gate reorder, transpose, layer-1 fusion, bias sums, bf16 MXU operands ---
    wih0 = reorder(params['wih0']).T.astype(jnp.bfloat16)               # (E, 4H)
    whh0 = reorder(params['whh0']).T                                    # (H, 4H)
    wih1 = reorder(params['wih1']).T                                    # (H, 4H)
    w0f = jnp.concatenate([whh0, wih1], axis=1).astype(jnp.bfloat16)    # (H, 8H)  [whh0 | wih1]
    whh1 = reorder(params['whh1']).T.astype(jnp.bfloat16)               # (H, 4H)
    b0 = reorder(params['bih0'] + params['bhh0'])[None, :].astype(jnp.float32)   # (1, 4H)
    b1 = reorder(params['bih1'] + params['bhh1'])[None, :].astype(jnp.float32)   # (1, 4H)
    wd = (params['linw'][1] - params['linw'][0])[:, None].astype(jnp.bfloat16)   # (H, 1)
    bd = (params['linb'][1] - params['linb'][0]).reshape(1, 1).astype(jnp.float32)

    flops = (2 * S * Bp * E * 4 * H                       # hoisted input projection
             + S * (2 * Bp * H * 8 * H + 2 * Bp * H * 4 * H)   # per-step recurrent dots
             + 2 * S * Bp * H)                            # decode matvec
    transcendentals = S * Bp * 10 * H + 3 * S * Bp
    bytes_accessed = (2 * (x2d.size + wih0.size + w0f.size + whh1.size + wd.size)
                      + 4 * (b0.size + b1.size + bd.size + lab2d.size + msk2d.size
                             + Bp + S * Bp))

    vmem = pl.BlockSpec(memory_space=pltpu.MemorySpace.VMEM)
    negloss, p1col = pl.pallas_call(
        robustnet_kernel,
        out_shape=(jax.ShapeDtypeStruct((Bp, 1), jnp.float32),
                   jax.ShapeDtypeStruct((S * Bp, 1), jnp.float32)),
        in_specs=[vmem] * 10,
        out_specs=(vmem, vmem),
        compiler_params=pltpu.CompilerParams(vmem_limit_bytes=32 * 1024 * 1024),
        cost_estimate=pl.CostEstimate(flops=flops,
                                      transcendentals=transcendentals,
                                      bytes_accessed=bytes_accessed),
    )(x2d, wih0, w0f, whh1, b0, b1, wd, bd, lab2d, msk2d)

    neg_logits = negloss[:B, 0]                                         # (B,)
    p1 = p1col.reshape(S, Bp)[:, :B].T                                  # (B, S)
    pred = jnp.stack([1.0 - p1, p1], axis=-1)                           # (B, S, 2) = softmax(dec)

    # --- accuracy bookkeeping (host Python loops in the original; vectorized here) ---
    correct0 = jnp.sum(jnp.argmax(label, -1) == jnp.argmax(pred, -1))
    count0 = B * S
    pred_pos = pred[..., 1] > 0.5
    label_pos = label[..., 1] == 1.0
    tp = jnp.sum(pred_pos & label_pos)
    count1 = jnp.sum(pred_pos)
    count2 = jnp.sum(label_pos)
    acc0 = correct0 / (count0 + 0.0001)
    acc1 = tp / (count1 + 0.0001)
    acc2 = tp / (count2 + 0.0001)
    counts = jnp.array([count0, count1, count2])
    return neg_logits, acc0, acc1, acc2, counts


if __name__ == "__main__":
    B, S, E, H, V = 2, 8, 16, 32, 10
    key = jax.random.PRNGKey(0)
    ks = jax.random.split(key, 13)
    bound = 1.0 / (H ** 0.5)

    def u(k, shape):
        return jax.random.uniform(k, shape, jnp.float32, -bound, bound)

    params = dict(
        wih0=u(ks[0], (4 * H, E)), whh0=u(ks[1], (4 * H, H)),
        bih0=u(ks[2], (4 * H,)),   bhh0=u(ks[3], (4 * H,)),
        wih1=u(ks[4], (4 * H, H)), whh1=u(ks[5], (4 * H, H)),
        bih1=u(ks[6], (4 * H,)),   bhh1=u(ks[7], (4 * H,)),
        linw=u(ks[8], (2, H)),     linb=u(ks[9], (2,)),
    )
    video_embeddings = jax.random.normal(ks[10], (V, E), jnp.float32)
    indices = jax.random.randint(ks[11], (B, S), 0, V)
    cls = jax.random.bernoulli(ks[12], 0.5, (B, S)).astype(jnp.int32)
    label = jax.nn.one_hot(cls, 2, dtype=jnp.float32)                   # (B, S, 2)
    lengths = jnp.array([S, S - 3])
    mask = (jnp.arange(S)[None, :] < lengths[:, None]).astype(jnp.float32)  # (B, S)

    neg_logits, acc0, acc1, acc2, counts = robustnet_forward(
        indices, label, mask, params, video_embeddings)
    jax.block_until_ready((neg_logits, acc0, acc1, acc2, counts))
    print("KERNEL_OK")
</pallas_src>

<mosaic_0001>
module attributes {stable_mosaic.version = 11 : i64} {
  func.func @robustnet_kernel(%arg0: memref<64x16xbf16, #tpu.memory_space<vmem>>, %arg1: memref<16x128xbf16, #tpu.memory_space<vmem>>, %arg2: memref<32x256xbf16, #tpu.memory_space<vmem>>, %arg3: memref<32x128xbf16, #tpu.memory_space<vmem>>, %arg4: memref<1x128xf32, #tpu.memory_space<vmem>>, %arg5: memref<1x128xf32, #tpu.memory_space<vmem>>, %arg6: memref<32x1xbf16, #tpu.memory_space<vmem>>, %arg7: memref<1x1xf32, #tpu.memory_space<vmem>>, %arg8: memref<64x2xf32, #tpu.memory_space<vmem>>, %arg9: memref<64x1xf32, #tpu.memory_space<vmem>>, %arg10: memref<8x1xf32, #tpu.memory_space<vmem>>, %arg11: memref<64x1xf32, #tpu.memory_space<vmem>>) attributes {dimension_semantics = [], scalar_prefetch = 0 : i64, scratch_operands = 0 : i64, tpu.core_type = #tpu.core_type<tc>} {
    %c0 = arith.constant 0 : index
    %c0_0 = arith.constant 0 : index
    %0 = vector.load %arg2[%c0, %c0_0] : memref<32x256xbf16, #tpu.memory_space<vmem>>, vector<32x256xbf16>
    %c0_1 = arith.constant 0 : index
    %c0_2 = arith.constant 0 : index
    %1 = vector.load %arg3[%c0_1, %c0_2] : memref<32x128xbf16, #tpu.memory_space<vmem>>, vector<32x128xbf16>
    %c0_3 = arith.constant 0 : index
    %c0_4 = arith.constant 0 : index
    %2 = vector.load %arg5[%c0_3, %c0_4] : memref<1x128xf32, #tpu.memory_space<vmem>>, vector<1x128xf32>
    %c0_5 = arith.constant 0 : index
    %c0_6 = arith.constant 0 : index
    %3 = vector.load %arg0[%c0_5, %c0_6] : memref<64x16xbf16, #tpu.memory_space<vmem>>, vector<64x16xbf16>
    %c0_7 = arith.constant 0 : index
    %c0_8 = arith.constant 0 : index
    %4 = vector.load %arg1[%c0_7, %c0_8] : memref<16x128xbf16, #tpu.memory_space<vmem>>, vector<16x128xbf16>
    %cst = arith.constant dense<0.000000e+00> : vector<64x128xf32>
    %5 = tpu.matmul %3, %4, %cst {dimension_numbers = #tpu.dot_dimension_numbers<[1], [0], [0], [1], [0, 0, 1, 1], [], []>} : vector<64x16xbf16>, vector<16x128xbf16>, vector<64x128xf32> -> vector<64x128xf32>
    %c0_9 = arith.constant 0 : index
    %c0_10 = arith.constant 0 : index
    %6 = vector.load %arg4[%c0_9, %c0_10] : memref<1x128xf32, #tpu.memory_space<vmem>>, vector<1x128xf32>
    %7 = vector.broadcast %6 : vector<1x128xf32> to vector<64x128xf32>
    %8 = arith.addf %5, %7 : vector<64x128xf32>
    %9 = vector.shape_cast %2 : vector<1x128xf32> to vector<1x128xf32>
    %10 = vector.broadcast %9 : vector<1x128xf32> to vector<8x128xf32>
    %cst_11 = arith.constant 0.000000e+00 : f32
    %11 = vector.broadcast %cst_11 : f32 to vector<8x32xf32>
    %12 = vector.extract_strided_slice %8 {offsets = [0, 0], sizes = [8, 128], strides = [1, 1]} : vector<64x128xf32> to vector<8x128xf32>
    %13 = vector.extract_strided_slice %12 {offsets = [0, 0], sizes = [8, 96], strides = [1, 1]} : vector<8x128xf32> to vector<8x96xf32>
    %14 = arith.negf %13 : vector<8x96xf32>
    %15 = math.exp %14 : vector<8x96xf32>
    %cst_12 = arith.constant 1.000000e+00 : f32
    %16 = vector.broadcast %cst_12 : f32 to vector<8x96xf32>
    %17 = arith.addf %16, %15 : vector<8x96xf32>
    %18 = arith.divf %16, %17 : vector<8x96xf32>
    %19 = vector.extract_strided_slice %12 {offsets = [0, 96], sizes = [8, 32], strides = [1, 1]} : vector<8x128xf32> to vector<8x32xf32>
    %20 = math.tanh %19 : vector<8x32xf32>
    %21 = vector.extract_strided_slice %18 {offsets = [0, 0], sizes = [8, 32], strides = [1, 1]} : vector<8x96xf32> to vector<8x32xf32>
    %22 = vector.extract_strided_slice %18 {offsets = [0, 32], sizes = [8, 32], strides = [1, 1]} : vector<8x96xf32> to vector<8x32xf32>
    %23 = vector.extract_strided_slice %18 {offsets = [0, 64], sizes = [8, 32], strides = [1, 1]} : vector<8x96xf32> to vector<8x32xf32>
    %24 = arith.mulf %22, %11 : vector<8x32xf32>
    %25 = arith.mulf %21, %20 : vector<8x32xf32>
    %26 = arith.addf %24, %25 : vector<8x32xf32>
    %27 = math.tanh %26 : vector<8x32xf32>
    %28 = arith.mulf %23, %27 : vector<8x32xf32>
    %29 = arith.truncf %28 : vector<8x32xf32> to vector<8x32xbf16>
    %cst_13 = arith.constant dense<0.000000e+00> : vector<8x256xf32>
    %30 = tpu.matmul %29, %0, %cst_13 {dimension_numbers = #tpu.dot_dimension_numbers<[1], [0], [0], [1], [0, 0, 1, 1], [], []>} : vector<8x32xbf16>, vector<32x256xbf16>, vector<8x256xf32> -> vector<8x256xf32>
    %31 = vector.extract_strided_slice %30 {offsets = [0, 128], sizes = [8, 128], strides = [1, 1]} : vector<8x256xf32> to vector<8x128xf32>
    %32 = arith.addf %31, %10 : vector<8x128xf32>
    %33 = vector.extract_strided_slice %32 {offsets = [0, 0], sizes = [8, 96], strides = [1, 1]} : vector<8x128xf32> to vector<8x96xf32>
    %34 = arith.negf %33 : vector<8x96xf32>
    %35 = math.exp %34 : vector<8x96xf32>
    %cst_14 = arith.constant 1.000000e+00 : f32
    %36 = vector.broadcast %cst_14 : f32 to vector<8x96xf32>
    %37 = arith.addf %36, %35 : vector<8x96xf32>
    %38 = arith.divf %36, %37 : vector<8x96xf32>
    %39 = vector.extract_strided_slice %32 {offsets = [0, 96], sizes = [8, 32], strides = [1, 1]} : vector<8x128xf32> to vector<8x32xf32>
    %40 = math.tanh %39 : vector<8x32xf32>
    %41 = vector.extract_strided_slice %38 {offsets = [0, 0], sizes = [8, 32], strides = [1, 1]} : vector<8x96xf32> to vector<8x32xf32>
    %42 = vector.extract_strided_slice %38 {offsets = [0, 32], sizes = [8, 32], strides = [1, 1]} : vector<8x96xf32> to vector<8x32xf32>
    %43 = vector.extract_strided_slice %38 {offsets = [0, 64], sizes = [8, 32], strides = [1, 1]} : vector<8x96xf32> to vector<8x32xf32>
    %44 = arith.mulf %42, %11 : vector<8x32xf32>
    %45 = arith.mulf %41, %40 : vector<8x32xf32>
    %46 = arith.addf %44, %45 : vector<8x32xf32>
    %47 = math.tanh %46 : vector<8x32xf32>
    %48 = arith.mulf %43, %47 : vector<8x32xf32>
    %49 = vector.extract_strided_slice %8 {offsets = [8, 0], sizes = [8, 128], strides = [1, 1]} : vector<64x128xf32> to vector<8x128xf32>
    %50 = vector.extract_strided_slice %30 {offsets = [0, 0], sizes = [8, 128], strides = [1, 1]} : vector<8x256xf32> to vector<8x128xf32>
    %51 = arith.addf %49, %50 : vector<8x128xf32>
    %52 = vector.extract_strided_slice %51 {offsets = [0, 0], sizes = [8, 96], strides = [1, 1]} : vector<8x128xf32> to vector<8x96xf32>
    %53 = arith.negf %52 : vector<8x96xf32>
    %54 = math.exp %53 : vector<8x96xf32>
    %cst_15 = arith.constant 1.000000e+00 : f32
    %55 = vector.broadcast %cst_15 : f32 to vector<8x96xf32>
    %56 = arith.addf %55, %54 : vector<8x96xf32>
    %57 = arith.divf %55, %56 : vector<8x96xf32>
    %58 = vector.extract_strided_slice %51 {offsets = [0, 96], sizes = [8, 32], strides = [1, 1]} : vector<8x128xf32> to vector<8x32xf32>
    %59 = math.tanh %58 : vector<8x32xf32>
    %60 = vector.extract_strided_slice %57 {offsets = [0, 0], sizes = [8, 32], strides = [1, 1]} : vector<8x96xf32> to vector<8x32xf32>
    %61 = vector.extract_strided_slice %57 {offsets = [0, 32], sizes = [8, 32], strides = [1, 1]} : vector<8x96xf32> to vector<8x32xf32>
    %62 = vector.extract_strided_slice %57 {offsets = [0, 64], sizes = [8, 32], strides = [1, 1]} : vector<8x96xf32> to vector<8x32xf32>
    %63 = arith.mulf %61, %26 : vector<8x32xf32>
    %64 = arith.mulf %60, %59 : vector<8x32xf32>
    %65 = arith.addf %63, %64 : vector<8x32xf32>
    %66 = math.tanh %65 : vector<8x32xf32>
    %67 = arith.mulf %62, %66 : vector<8x32xf32>
    %68 = arith.truncf %67 : vector<8x32xf32> to vector<8x32xbf16>
    %cst_16 = arith.constant dense<0.000000e+00> : vector<8x256xf32>
    %69 = tpu.matmul %68, %0, %cst_16 {dimension_numbers = #tpu.dot_dimension_numbers<[1], [0], [0], [1], [0, 0, 1, 1], [], []>} : vector<8x32xbf16>, vector<32x256xbf16>, vector<8x256xf32> -> vector<8x256xf32>
    %70 = arith.truncf %48 : vector<8x32xf32> to vector<8x32xbf16>
    %cst_17 = arith.constant dense<0.000000e+00> : vector<8x128xf32>
    %71 = tpu.matmul %70, %1, %cst_17 {dimension_numbers = #tpu.dot_dimension_numbers<[1], [0], [0], [1], [0, 0, 1, 1], [], []>} : vector<8x32xbf16>, vector<32x128xbf16>, vector<8x128xf32> -> vector<8x128xf32>
    %72 = vector.extract_strided_slice %69 {offsets = [0, 128], sizes = [8, 128], strides = [1, 1]} : vector<8x256xf32> to vector<8x128xf32>
    %73 = arith.addf %72, %71 : vector<8x128xf32>
    %74 = arith.addf %73, %10 : vector<8x128xf32>
    %75 = vector.extract_strided_slice %74 {offsets = [0, 0], sizes = [8, 96], strides = [1, 1]} : vector<8x128xf32> to vector<8x96xf32>
    %76 = arith.negf %75 : vector<8x96xf32>
    %77 = math.exp %76 : vector<8x96xf32>
    %cst_18 = arith.constant 1.000000e+00 : f32
    %78 = vector.broadcast %cst_18 : f32 to vector<8x96xf32>
    %79 = arith.addf %78, %77 : vector<8x96xf32>
    %80 = arith.divf %78, %79 : vector<8x96xf32>
    %81 = vector.extract_strided_slice %74 {offsets = [0, 96], sizes = [8, 32], strides = [1, 1]} : vector<8x128xf32> to vector<8x32xf32>
    %82 = math.tanh %81 : vector<8x32xf32>
    %83 = vector.extract_strided_slice %80 {offsets = [0, 0], sizes = [8, 32], strides = [1, 1]} : vector<8x96xf32> to vector<8x32xf32>
    %84 = vector.extract_strided_slice %80 {offsets = [0, 32], sizes = [8, 32], strides = [1, 1]} : vector<8x96xf32> to vector<8x32xf32>
    %85 = vector.extract_strided_slice %80 {offsets = [0, 64], sizes = [8, 32], strides = [1, 1]} : vector<8x96xf32> to vector<8x32xf32>
    %86 = arith.mulf %84, %46 : vector<8x32xf32>
    %87 = arith.mulf %83, %82 : vector<8x32xf32>
    %88 = arith.addf %86, %87 : vector<8x32xf32>
    %89 = math.tanh %88 : vector<8x32xf32>
    %90 = arith.mulf %85, %89 : vector<8x32xf32>
    %91 = vector.extract_strided_slice %8 {offsets = [16, 0], sizes = [8, 128], strides = [1, 1]} : vector<64x128xf32> to vector<8x128xf32>
    %92 = vector.extract_strided_slice %69 {offsets = [0, 0], sizes = [8, 128], strides = [1, 1]} : vector<8x256xf32> to vector<8x128xf32>
    %93 = arith.addf %91, %92 : vector<8x128xf32>
    %94 = vector.extract_strided_slice %93 {offsets = [0, 0], sizes = [8, 96], strides = [1, 1]} : vector<8x128xf32> to vector<8x96xf32>
    %95 = arith.negf %94 : vector<8x96xf32>
    %96 = math.exp %95 : vector<8x96xf32>
    %cst_19 = arith.constant 1.000000e+00 : f32
    %97 = vector.broadcast %cst_19 : f32 to vector<8x96xf32>
    %98 = arith.addf %97, %96 : vector<8x96xf32>
    %99 = arith.divf %97, %98 : vector<8x96xf32>
    %100 = vector.extract_strided_slice %93 {offsets = [0, 96], sizes = [8, 32], strides = [1, 1]} : vector<8x128xf32> to vector<8x32xf32>
    %101 = math.tanh %100 : vector<8x32xf32>
    %102 = vector.extract_strided_slice %99 {offsets = [0, 0], sizes = [8, 32], strides = [1, 1]} : vector<8x96xf32> to vector<8x32xf32>
    %103 = vector.extract_strided_slice %99 {offsets = [0, 32], sizes = [8, 32], strides = [1, 1]} : vector<8x96xf32> to vector<8x32xf32>
    %104 = vector.extract_strided_slice %99 {offsets = [0, 64], sizes = [8, 32], strides = [1, 1]} : vector<8x96xf32> to vector<8x32xf32>
    %105 = arith.mulf %103, %65 : vector<8x32xf32>
    %106 = arith.mulf %102, %101 : vector<8x32xf32>
    %107 = arith.addf %105, %106 : vector<8x32xf32>
    %108 = math.tanh %107 : vector<8x32xf32>
    %109 = arith.mulf %104, %108 : vector<8x32xf32>
    %110 = arith.truncf %109 : vector<8x32xf32> to vector<8x32xbf16>
    %cst_20 = arith.constant dense<0.000000e+00> : vector<8x256xf32>
    %111 = tpu.matmul %110, %0, %cst_20 {dimension_numbers = #tpu.dot_dimension_numbers<[1], [0], [0], [1], [0, 0, 1, 1], [], []>} : vector<8x32xbf16>, vector<32x256xbf16>, vector<8x256xf32> -> vector<8x256xf32>
    %112 = arith.truncf %90 : vector<8x32xf32> to vector<8x32xbf16>
    %cst_21 = arith.constant dense<0.000000e+00> : vector<8x128xf32>
    %113 = tpu.matmul %112, %1, %cst_21 {dimension_numbers = #tpu.dot_dimension_numbers<[1], [0], [0], [1], [0, 0, 1, 1], [], []>} : vector<8x32xbf16>, vector<32x128xbf16>, vector<8x128xf32> -> vector<8x128xf32>
    %114 = vector.extract_strided_slice %111 {offsets = [0, 128], sizes = [8, 128], strides = [1, 1]} : vector<8x256xf32> to vector<8x128xf32>
    %115 = arith.addf %114, %113 : vector<8x128xf32>
    %116 = arith.addf %115, %10 : vector<8x128xf32>
    %117 = vector.extract_strided_slice %116 {offsets = [0, 0], sizes = [8, 96], strides = [1, 1]} : vector<8x128xf32> to vector<8x96xf32>
    %118 = arith.negf %117 : vector<8x96xf32>
    %119 = math.exp %118 : vector<8x96xf32>
    %cst_22 = arith.constant 1.000000e+00 : f32
    %120 = vector.broadcast %cst_22 : f32 to vector<8x96xf32>
    %121 = arith.addf %120, %119 : vector<8x96xf32>
    %122 = arith.divf %120, %121 : vector<8x96xf32>
    %123 = vector.extract_strided_slice %116 {offsets = [0, 96], sizes = [8, 32], strides = [1, 1]} : vector<8x128xf32> to vector<8x32xf32>
    %124 = math.tanh %123 : vector<8x32xf32>
    %125 = vector.extract_strided_slice %122 {offsets = [0, 0], sizes = [8, 32], strides = [1, 1]} : vector<8x96xf32> to vector<8x32xf32>
    %126 = vector.extract_strided_slice %122 {offsets = [0, 32], sizes = [8, 32], strides = [1, 1]} : vector<8x96xf32> to vector<8x32xf32>
    %127 = vector.extract_strided_slice %122 {offsets = [0, 64], sizes = [8, 32], strides = [1, 1]} : vector<8x96xf32> to vector<8x32xf32>
    %128 = arith.mulf %126, %88 : vector<8x32xf32>
    %129 = arith.mulf %125, %124 : vector<8x32xf32>
    %130 = arith.addf %128, %129 : vector<8x32xf32>
    %131 = math.tanh %130 : vector<8x32xf32>
    %132 = arith.mulf %127, %131 : vector<8x32xf32>
    %133 = vector.extract_strided_slice %8 {offsets = [24, 0], sizes = [8, 128], strides = [1, 1]} : vector<64x128xf32> to vector<8x128xf32>
    %134 = vector.extract_strided_slice %111 {offsets = [0, 0], sizes = [8, 128], strides = [1, 1]} : vector<8x256xf32> to vector<8x128xf32>
    %135 = arith.addf %133, %134 : vector<8x128xf32>
    %136 = vector.extract_strided_slice %135 {offsets = [0, 0], sizes = [8, 96], strides = [1, 1]} : vector<8x128xf32> to vector<8x96xf32>
    %137 = arith.negf %136 : vector<8x96xf32>
    %138 = math.exp %137 : vector<8x96xf32>
    %cst_23 = arith.constant 1.000000e+00 : f32
    %139 = vector.broadcast %cst_23 : f32 to vector<8x96xf32>
    %140 = arith.addf %139, %138 : vector<8x96xf32>
    %141 = arith.divf %139, %140 : vector<8x96xf32>
    %142 = vector.extract_strided_slice %135 {offsets = [0, 96], sizes = [8, 32], strides = [1, 1]} : vector<8x128xf32> to vector<8x32xf32>
    %143 = math.tanh %142 : vector<8x32xf32>
    %144 = vector.extract_strided_slice %141 {offsets = [0, 0], sizes = [8, 32], strides = [1, 1]} : vector<8x96xf32> to vector<8x32xf32>
    %145 = vector.extract_strided_slice %141 {offsets = [0, 32], sizes = [8, 32], strides = [1, 1]} : vector<8x96xf32> to vector<8x32xf32>
    %146 = vector.extract_strided_slice %141 {offsets = [0, 64], sizes = [8, 32], strides = [1, 1]} : vector<8x96xf32> to vector<8x32xf32>
    %147 = arith.mulf %145, %107 : vector<8x32xf32>
    %148 = arith.mulf %144, %143 : vector<8x32xf32>
    %149 = arith.addf %147, %148 : vector<8x32xf32>
    %150 = math.tanh %149 : vector<8x32xf32>
    %151 = arith.mulf %146, %150 : vector<8x32xf32>
    %152 = arith.truncf %151 : vector<8x32xf32> to vector<8x32xbf16>
    %cst_24 = arith.constant dense<0.000000e+00> : vector<8x256xf32>
    %153 = tpu.matmul %152, %0, %cst_24 {dimension_numbers = #tpu.dot_dimension_numbers<[1], [0], [0], [1], [0, 0, 1, 1], [], []>} : vector<8x32xbf16>, vector<32x256xbf16>, vector<8x256xf32> -> vector<8x256xf32>
    %154 = arith.truncf %132 : vector<8x32xf32> to vector<8x32xbf16>
    %cst_25 = arith.constant dense<0.000000e+00> : vector<8x128xf32>
    %155 = tpu.matmul %154, %1, %cst_25 {dimension_numbers = #tpu.dot_dimension_numbers<[1], [0], [0], [1], [0, 0, 1, 1], [], []>} : vector<8x32xbf16>, vector<32x128xbf16>, vector<8x128xf32> -> vector<8x128xf32>
    %156 = vector.extract_strided_slice %153 {offsets = [0, 128], sizes = [8, 128], strides = [1, 1]} : vector<8x256xf32> to vector<8x128xf32>
    %157 = arith.addf %156, %155 : vector<8x128xf32>
    %158 = arith.addf %157, %10 : vector<8x128xf32>
    %159 = vector.extract_strided_slice %158 {offsets = [0, 0], sizes = [8, 96], strides = [1, 1]} : vector<8x128xf32> to vector<8x96xf32>
    %160 = arith.negf %159 : vector<8x96xf32>
    %161 = math.exp %160 : vector<8x96xf32>
    %cst_26 = arith.constant 1.000000e+00 : f32
    %162 = vector.broadcast %cst_26 : f32 to vector<8x96xf32>
    %163 = arith.addf %162, %161 : vector<8x96xf32>
    %164 = arith.divf %162, %163 : vector<8x96xf32>
    %165 = vector.extract_strided_slice %158 {offsets = [0, 96], sizes = [8, 32], strides = [1, 1]} : vector<8x128xf32> to vector<8x32xf32>
    %166 = math.tanh %165 : vector<8x32xf32>
    %167 = vector.extract_strided_slice %164 {offsets = [0, 0], sizes = [8, 32], strides = [1, 1]} : vector<8x96xf32> to vector<8x32xf32>
    %168 = vector.extract_strided_slice %164 {offsets = [0, 32], sizes = [8, 32], strides = [1, 1]} : vector<8x96xf32> to vector<8x32xf32>
    %169 = vector.extract_strided_slice %164 {offsets = [0, 64], sizes = [8, 32], strides = [1, 1]} : vector<8x96xf32> to vector<8x32xf32>
    %170 = arith.mulf %168, %130 : vector<8x32xf32>
    %171 = arith.mulf %167, %166 : vector<8x32xf32>
    %172 = arith.addf %170, %171 : vector<8x32xf32>
    %173 = math.tanh %172 : vector<8x32xf32>
    %174 = arith.mulf %169, %173 : vector<8x32xf32>
    %175 = vector.extract_strided_slice %8 {offsets = [32, 0], sizes = [8, 128], strides = [1, 1]} : vector<64x128xf32> to vector<8x128xf32>
    %176 = vector.extract_strided_slice %153 {offsets = [0, 0], sizes = [8, 128], strides = [1, 1]} : vector<8x256xf32> to vector<8x128xf32>
    %177 = arith.addf %175, %176 : vector<8x128xf32>
    %178 = vector.extract_strided_slice %177 {offsets = [0, 0], sizes = [8, 96], strides = [1, 1]} : vector<8x128xf32> to vector<8x96xf32>
    %179 = arith.negf %178 : vector<8x96xf32>
    %180 = math.exp %179 : vector<8x96xf32>
    %cst_27 = arith.constant 1.000000e+00 : f32
    %181 = vector.broadcast %cst_27 : f32 to vector<8x96xf32>
    %182 = arith.addf %181, %180 : vector<8x96xf32>
    %183 = arith.divf %181, %182 : vector<8x96xf32>
    %184 = vector.extract_strided_slice %177 {offsets = [0, 96], sizes = [8, 32], strides = [1, 1]} : vector<8x128xf32> to vector<8x32xf32>
    %185 = math.tanh %184 : vector<8x32xf32>
    %186 = vector.extract_strided_slice %183 {offsets = [0, 0], sizes = [8, 32], strides = [1, 1]} : vector<8x96xf32> to vector<8x32xf32>
    %187 = vector.extract_strided_slice %183 {offsets = [0, 32], sizes = [8, 32], strides = [1, 1]} : vector<8x96xf32> to vector<8x32xf32>
    %188 = vector.extract_strided_slice %183 {offsets = [0, 64], sizes = [8, 32], strides = [1, 1]} : vector<8x96xf32> to vector<8x32xf32>
    %189 = arith.mulf %187, %149 : vector<8x32xf32>
    %190 = arith.mulf %186, %185 : vector<8x32xf32>
    %191 = arith.addf %189, %190 : vector<8x32xf32>
    %192 = math.tanh %191 : vector<8x32xf32>
    %193 = arith.mulf %188, %192 : vector<8x32xf32>
    %194 = arith.truncf %193 : vector<8x32xf32> to vector<8x32xbf16>
    %cst_28 = arith.constant dense<0.000000e+00> : vector<8x256xf32>
    %195 = tpu.matmul %194, %0, %cst_28 {dimension_numbers = #tpu.dot_dimension_numbers<[1], [0], [0], [1], [0, 0, 1, 1], [], []>} : vector<8x32xbf16>, vector<32x256xbf16>, vector<8x256xf32> -> vector<8x256xf32>
    %196 = arith.truncf %174 : vector<8x32xf32> to vector<8x32xbf16>
    %cst_29 = arith.constant dense<0.000000e+00> : vector<8x128xf32>
    %197 = tpu.matmul %196, %1, %cst_29 {dimension_numbers = #tpu.dot_dimension_numbers<[1], [0], [0], [1], [0, 0, 1, 1], [], []>} : vector<8x32xbf16>, vector<32x128xbf16>, vector<8x128xf32> -> vector<8x128xf32>
    %198 = vector.extract_strided_slice %195 {offsets = [0, 128], sizes = [8, 128], strides = [1, 1]} : vector<8x256xf32> to vector<8x128xf32>
    %199 = arith.addf %198, %197 : vector<8x128xf32>
    %200 = arith.addf %199, %10 : vector<8x128xf32>
    %201 = vector.extract_strided_slice %200 {offsets = [0, 0], sizes = [8, 96], strides = [1, 1]} : vector<8x128xf32> to vector<8x96xf32>
    %202 = arith.negf %201 : vector<8x96xf32>
    %203 = math.exp %202 : vector<8x96xf32>
    %cst_30 = arith.constant 1.000000e+00 : f32
    %204 = vector.broadcast %cst_30 : f32 to vector<8x96xf32>
    %205 = arith.addf %204, %203 : vector<8x96xf32>
    %206 = arith.divf %204, %205 : vector<8x96xf32>
    %207 = vector.extract_strided_slice %200 {offsets = [0, 96], sizes = [8, 32], strides = [1, 1]} : vector<8x128xf32> to vector<8x32xf32>
    %208 = math.tanh %207 : vector<8x32xf32>
    %209 = vector.extract_strided_slice %206 {offsets = [0, 0], sizes = [8, 32], strides = [1, 1]} : vector<8x96xf32> to vector<8x32xf32>
    %210 = vector.extract_strided_slice %206 {offsets = [0, 32], sizes = [8, 32], strides = [1, 1]} : vector<8x96xf32> to vector<8x32xf32>
    %211 = vector.extract_strided_slice %206 {offsets = [0, 64], sizes = [8, 32], strides = [1, 1]} : vector<8x96xf32> to vector<8x32xf32>
    %212 = arith.mulf %210, %172 : vector<8x32xf32>
    %213 = arith.mulf %209, %208 : vector<8x32xf32>
    %214 = arith.addf %212, %213 : vector<8x32xf32>
    %215 = math.tanh %214 : vector<8x32xf32>
    %216 = arith.mulf %211, %215 : vector<8x32xf32>
    %217 = vector.extract_strided_slice %8 {offsets = [40, 0], sizes = [8, 128], strides = [1, 1]} : vector<64x128xf32> to vector<8x128xf32>
    %218 = vector.extract_strided_slice %195 {offsets = [0, 0], sizes = [8, 128], strides = [1, 1]} : vector<8x256xf32> to vector<8x128xf32>
    %219 = arith.addf %217, %218 : vector<8x128xf32>
    %220 = vector.extract_strided_slice %219 {offsets = [0, 0], sizes = [8, 96], strides = [1, 1]} : vector<8x128xf32> to vector<8x96xf32>
    %221 = arith.negf %220 : vector<8x96xf32>
    %222 = math.exp %221 : vector<8x96xf32>
    %cst_31 = arith.constant 1.000000e+00 : f32
    %223 = vector.broadcast %cst_31 : f32 to vector<8x96xf32>
    %224 = arith.addf %223, %222 : vector<8x96xf32>
    %225 = arith.divf %223, %224 : vector<8x96xf32>
    %226 = vector.extract_strided_slice %219 {offsets = [0, 96], sizes = [8, 32], strides = [1, 1]} : vector<8x128xf32> to vector<8x32xf32>
    %227 = math.tanh %226 : vector<8x32xf32>
    %228 = vector.extract_strided_slice %225 {offsets = [0, 0], sizes = [8, 32], strides = [1, 1]} : vector<8x96xf32> to vector<8x32xf32>
    %229 = vector.extract_strided_slice %225 {offsets = [0, 32], sizes = [8, 32], strides = [1, 1]} : vector<8x96xf32> to vector<8x32xf32>
    %230 = vector.extract_strided_slice %225 {offsets = [0, 64], sizes = [8, 32], strides = [1, 1]} : vector<8x96xf32> to vector<8x32xf32>
    %231 = arith.mulf %229, %191 : vector<8x32xf32>
    %232 = arith.mulf %228, %227 : vector<8x32xf32>
    %233 = arith.addf %231, %232 : vector<8x32xf32>
    %234 = math.tanh %233 : vector<8x32xf32>
    %235 = arith.mulf %230, %234 : vector<8x32xf32>
    %236 = arith.truncf %235 : vector<8x32xf32> to vector<8x32xbf16>
    %cst_32 = arith.constant dense<0.000000e+00> : vector<8x256xf32>
    %237 = tpu.matmul %236, %0, %cst_32 {dimension_numbers = #tpu.dot_dimension_numbers<[1], [0], [0], [1], [0, 0, 1, 1], [], []>} : vector<8x32xbf16>, vector<32x256xbf16>, vector<8x256xf32> -> vector<8x256xf32>
    %238 = arith.truncf %216 : vector<8x32xf32> to vector<8x32xbf16>
    %cst_33 = arith.constant dense<0.000000e+00> : vector<8x128xf32>
    %239 = tpu.matmul %238, %1, %cst_33 {dimension_numbers = #tpu.dot_dimension_numbers<[1], [0], [0], [1], [0, 0, 1, 1], [], []>} : vector<8x32xbf16>, vector<32x128xbf16>, vector<8x128xf32> -> vector<8x128xf32>
    %240 = vector.extract_strided_slice %237 {offsets = [0, 128], sizes = [8, 128], strides = [1, 1]} : vector<8x256xf32> to vector<8x128xf32>
    %241 = arith.addf %240, %239 : vector<8x128xf32>
    %242 = arith.addf %241, %10 : vector<8x128xf32>
    %243 = vector.extract_strided_slice %242 {offsets = [0, 0], sizes = [8, 96], strides = [1, 1]} : vector<8x128xf32> to vector<8x96xf32>
    %244 = arith.negf %243 : vector<8x96xf32>
    %245 = math.exp %244 : vector<8x96xf32>
    %cst_34 = arith.constant 1.000000e+00 : f32
    %246 = vector.broadcast %cst_34 : f32 to vector<8x96xf32>
    %247 = arith.addf %246, %245 : vector<8x96xf32>
    %248 = arith.divf %246, %247 : vector<8x96xf32>
    %249 = vector.extract_strided_slice %242 {offsets = [0, 96], sizes = [8, 32], strides = [1, 1]} : vector<8x128xf32> to vector<8x32xf32>
    %250 = math.tanh %249 : vector<8x32xf32>
    %251 = vector.extract_strided_slice %248 {offsets = [0, 0], sizes = [8, 32], strides = [1, 1]} : vector<8x96xf32> to vector<8x32xf32>
    %252 = vector.extract_strided_slice %248 {offsets = [0, 32], sizes = [8, 32], strides = [1, 1]} : vector<8x96xf32> to vector<8x32xf32>
    %253 = vector.extract_strided_slice %248 {offsets = [0, 64], sizes = [8, 32], strides = [1, 1]} : vector<8x96xf32> to vector<8x32xf32>
    %254 = arith.mulf %252, %214 : vector<8x32xf32>
    %255 = arith.mulf %251, %250 : vector<8x32xf32>
    %256 = arith.addf %254, %255 : vector<8x32xf32>
    %257 = math.tanh %256 : vector<8x32xf32>
    %258 = arith.mulf %253, %257 : vector<8x32xf32>
    %259 = vector.extract_strided_slice %8 {offsets = [48, 0], sizes = [8, 128], strides = [1, 1]} : vector<64x128xf32> to vector<8x128xf32>
    %260 = vector.extract_strided_slice %237 {offsets = [0, 0], sizes = [8, 128], strides = [1, 1]} : vector<8x256xf32> to vector<8x128xf32>
    %261 = arith.addf %259, %260 : vector<8x128xf32>
    %262 = vector.extract_strided_slice %261 {offsets = [0, 0], sizes = [8, 96], strides = [1, 1]} : vector<8x128xf32> to vector<8x96xf32>
    %263 = arith.negf %262 : vector<8x96xf32>
    %264 = math.exp %263 : vector<8x96xf32>
    %cst_35 = arith.constant 1.000000e+00 : f32
    %265 = vector.broadcast %cst_35 : f32 to vector<8x96xf32>
    %266 = arith.addf %265, %264 : vector<8x96xf32>
    %267 = arith.divf %265, %266 : vector<8x96xf32>
    %268 = vector.extract_strided_slice %261 {offsets = [0, 96], sizes = [8, 32], strides = [1, 1]} : vector<8x128xf32> to vector<8x32xf32>
    %269 = math.tanh %268 : vector<8x32xf32>
    %270 = vector.extract_strided_slice %267 {offsets = [0, 0], sizes = [8, 32], strides = [1, 1]} : vector<8x96xf32> to vector<8x32xf32>
    %271 = vector.extract_strided_slice %267 {offsets = [0, 32], sizes = [8, 32], strides = [1, 1]} : vector<8x96xf32> to vector<8x32xf32>
    %272 = vector.extract_strided_slice %267 {offsets = [0, 64], sizes = [8, 32], strides = [1, 1]} : vector<8x96xf32> to vector<8x32xf32>
    %273 = arith.mulf %271, %233 : vector<8x32xf32>
    %274 = arith.mulf %270, %269 : vector<8x32xf32>
    %275 = arith.addf %273, %274 : vector<8x32xf32>
    %276 = math.tanh %275 : vector<8x32xf32>
    %277 = arith.mulf %272, %276 : vector<8x32xf32>
    %278 = arith.truncf %277 : vector<8x32xf32> to vector<8x32xbf16>
    %cst_36 = arith.constant dense<0.000000e+00> : vector<8x256xf32>
    %279 = tpu.matmul %278, %0, %cst_36 {dimension_numbers = #tpu.dot_dimension_numbers<[1], [0], [0], [1], [0, 0, 1, 1], [], []>} : vector<8x32xbf16>, vector<32x256xbf16>, vector<8x256xf32> -> vector<8x256xf32>
    %280 = arith.truncf %258 : vector<8x32xf32> to vector<8x32xbf16>
    %cst_37 = arith.constant dense<0.000000e+00> : vector<8x128xf32>
    %281 = tpu.matmul %280, %1, %cst_37 {dimension_numbers = #tpu.dot_dimension_numbers<[1], [0], [0], [1], [0, 0, 1, 1], [], []>} : vector<8x32xbf16>, vector<32x128xbf16>, vector<8x128xf32> -> vector<8x128xf32>
    %282 = vector.extract_strided_slice %279 {offsets = [0, 128], sizes = [8, 128], strides = [1, 1]} : vector<8x256xf32> to vector<8x128xf32>
    %283 = arith.addf %282, %281 : vector<8x128xf32>
    %284 = arith.addf %283, %10 : vector<8x128xf32>
    %285 = vector.extract_strided_slice %284 {offsets = [0, 0], sizes = [8, 96], strides = [1, 1]} : vector<8x128xf32> to vector<8x96xf32>
    %286 = arith.negf %285 : vector<8x96xf32>
    %287 = math.exp %286 : vector<8x96xf32>
    %cst_38 = arith.constant 1.000000e+00 : f32
    %288 = vector.broadcast %cst_38 : f32 to vector<8x96xf32>
    %289 = arith.addf %288, %287 : vector<8x96xf32>
    %290 = arith.divf %288, %289 : vector<8x96xf32>
    %291 = vector.extract_strided_slice %284 {offsets = [0, 96], sizes = [8, 32], strides = [1, 1]} : vector<8x128xf32> to vector<8x32xf32>
    %292 = math.tanh %291 : vector<8x32xf32>
    %293 = vector.extract_strided_slice %290 {offsets = [0, 0], sizes = [8, 32], strides = [1, 1]} : vector<8x96xf32> to vector<8x32xf32>
    %294 = vector.extract_strided_slice %290 {offsets = [0, 32], sizes = [8, 32], strides = [1, 1]} : vector<8x96xf32> to vector<8x32xf32>
    %295 = vector.extract_strided_slice %290 {offsets = [0, 64], sizes = [8, 32], strides = [1, 1]} : vector<8x96xf32> to vector<8x32xf32>
    %296 = arith.mulf %294, %256 : vector<8x32xf32>
    %297 = arith.mulf %293, %292 : vector<8x32xf32>
    %298 = arith.addf %296, %297 : vector<8x32xf32>
    %299 = math.tanh %298 : vector<8x32xf32>
    %300 = arith.mulf %295, %299 : vector<8x32xf32>
    %301 = vector.extract_strided_slice %8 {offsets = [56, 0], sizes = [8, 128], strides = [1, 1]} : vector<64x128xf32> to vector<8x128xf32>
    %302 = vector.extract_strided_slice %279 {offsets = [0, 0], sizes = [8, 128], strides = [1, 1]} : vector<8x256xf32> to vector<8x128xf32>
    %303 = arith.addf %301, %302 : vector<8x128xf32>
    %304 = vector.extract_strided_slice %303 {offsets = [0, 0], sizes = [8, 96], strides = [1, 1]} : vector<8x128xf32> to vector<8x96xf32>
    %305 = arith.negf %304 : vector<8x96xf32>
    %306 = math.exp %305 : vector<8x96xf32>
    %cst_39 = arith.constant 1.000000e+00 : f32
    %307 = vector.broadcast %cst_39 : f32 to vector<8x96xf32>
    %308 = arith.addf %307, %306 : vector<8x96xf32>
    %309 = arith.divf %307, %308 : vector<8x96xf32>
    %310 = vector.extract_strided_slice %303 {offsets = [0, 96], sizes = [8, 32], strides = [1, 1]} : vector<8x128xf32> to vector<8x32xf32>
    %311 = math.tanh %310 : vector<8x32xf32>
    %312 = vector.extract_strided_slice %309 {offsets = [0, 0], sizes = [8, 32], strides = [1, 1]} : vector<8x96xf32> to vector<8x32xf32>
    %313 = vector.extract_strided_slice %309 {offsets = [0, 32], sizes = [8, 32], strides = [1, 1]} : vector<8x96xf32> to vector<8x32xf32>
    %314 = vector.extract_strided_slice %309 {offsets = [0, 64], sizes = [8, 32], strides = [1, 1]} : vector<8x96xf32> to vector<8x32xf32>
    %315 = arith.mulf %313, %275 : vector<8x32xf32>
    %316 = arith.mulf %312, %311 : vector<8x32xf32>
    %317 = arith.addf %315, %316 : vector<8x32xf32>
    %318 = math.tanh %317 : vector<8x32xf32>
    %319 = arith.mulf %314, %318 : vector<8x32xf32>
    %320 = arith.truncf %319 : vector<8x32xf32> to vector<8x32xbf16>
    %cst_40 = arith.constant dense<0.000000e+00> : vector<8x256xf32>
    %321 = tpu.matmul %320, %0, %cst_40 {dimension_numbers = #tpu.dot_dimension_numbers<[1], [0], [0], [1], [0, 0, 1, 1], [], []>} : vector<8x32xbf16>, vector<32x256xbf16>, vector<8x256xf32> -> vector<8x256xf32>
    %322 = arith.truncf %300 : vector<8x32xf32> to vector<8x32xbf16>
    %cst_41 = arith.constant dense<0.000000e+00> : vector<8x128xf32>
    %323 = tpu.matmul %322, %1, %cst_41 {dimension_numbers = #tpu.dot_dimension_numbers<[1], [0], [0], [1], [0, 0, 1, 1], [], []>} : vector<8x32xbf16>, vector<32x128xbf16>, vector<8x128xf32> -> vector<8x128xf32>
    %324 = vector.extract_strided_slice %321 {offsets = [0, 128], sizes = [8, 128], strides = [1, 1]} : vector<8x256xf32> to vector<8x128xf32>
    %325 = arith.addf %324, %323 : vector<8x128xf32>
    %326 = arith.addf %325, %10 : vector<8x128xf32>
    %327 = vector.extract_strided_slice %326 {offsets = [0, 0], sizes = [8, 96], strides = [1, 1]} : vector<8x128xf32> to vector<8x96xf32>
    %328 = arith.negf %327 : vector<8x96xf32>
    %329 = math.exp %328 : vector<8x96xf32>
    %cst_42 = arith.constant 1.000000e+00 : f32
    %330 = vector.broadcast %cst_42 : f32 to vector<8x96xf32>
    %331 = arith.addf %330, %329 : vector<8x96xf32>
    %332 = arith.divf %330, %331 : vector<8x96xf32>
    %333 = vector.extract_strided_slice %326 {offsets = [0, 96], sizes = [8, 32], strides = [1, 1]} : vector<8x128xf32> to vector<8x32xf32>
    %334 = math.tanh %333 : vector<8x32xf32>
    %335 = vector.extract_strided_slice %332 {offsets = [0, 0], sizes = [8, 32], strides = [1, 1]} : vector<8x96xf32> to vector<8x32xf32>
    %336 = vector.extract_strided_slice %332 {offsets = [0, 32], sizes = [8, 32], strides = [1, 1]} : vector<8x96xf32> to vector<8x32xf32>
    %337 = vector.extract_strided_slice %332 {offsets = [0, 64], sizes = [8, 32], strides = [1, 1]} : vector<8x96xf32> to vector<8x32xf32>
    %338 = arith.mulf %336, %298 : vector<8x32xf32>
    %339 = arith.mulf %335, %334 : vector<8x32xf32>
    %340 = arith.addf %338, %339 : vector<8x32xf32>
    %341 = math.tanh %340 : vector<8x32xf32>
    %342 = arith.mulf %337, %341 : vector<8x32xf32>
    %343 = tpu.concatenate %48, %90, %132, %174, %216, %258, %300, %342 in 0 : vector<8x32xf32>, vector<8x32xf32>, vector<8x32xf32>, vector<8x32xf32>, vector<8x32xf32>, vector<8x32xf32>, vector<8x32xf32>, vector<8x32xf32> -> vector<64x32xf32>
    %344 = arith.truncf %343 : vector<64x32xf32> to vector<64x32xbf16>
    %c0_43 = arith.constant 0 : index
    %c0_44 = arith.constant 0 : index
    %345 = vector.load %arg6[%c0_43, %c0_44] : memref<32x1xbf16, #tpu.memory_space<vmem>>, vector<32x1xbf16>
    %cst_45 = arith.constant dense<0.000000e+00> : vector<64x1xf32>
    %346 = tpu.matmul %344, %345, %cst_45 {dimension_numbers = #tpu.dot_dimension_numbers<[1], [0], [0], [1], [0, 0, 1, 1], [], []>} : vector<64x32xbf16>, vector<32x1xbf16>, vector<64x1xf32> -> vector<64x1xf32>
    %c0_46 = arith.constant 0 : index
    %c0_47 = arith.constant 0 : index
    %347 = vector.load %arg7[%c0_46, %c0_47] : memref<1x1xf32, #tpu.memory_space<vmem>>, vector<1x1xf32>
    %348 = vector.broadcast %347 : vector<1x1xf32> to vector<64x1xf32>
    %349 = arith.addf %346, %348 : vector<64x1xf32>
    %350 = arith.negf %349 : vector<64x1xf32>
    %351 = math.exp %350 : vector<64x1xf32>
    %cst_48 = arith.constant 1.000000e+00 : f32
    %352 = vector.broadcast %cst_48 : f32 to vector<64x1xf32>
    %353 = arith.addf %352, %351 : vector<64x1xf32>
    %354 = arith.divf %352, %353 : vector<64x1xf32>
    %cst_49 = arith.constant 0.000000e+00 : f32
    %355 = vector.broadcast %cst_49 : f32 to vector<64x1xf32>
    %356 = arith.maximumf %349, %355 : vector<64x1xf32>
    %357 = math.absf %349 : vector<64x1xf32>
    %cst_50 = arith.constant 0.000000e+00 : f32
    %358 = vector.broadcast %cst_50 : f32 to vector<64x1xf32>
    %359 = arith.subf %358, %357 : vector<64x1xf32>
    %360 = math.exp %359 : vector<64x1xf32>
    %cst_51 = arith.constant 1.000000e+00 : f32
    %361 = vector.broadcast %cst_51 : f32 to vector<64x1xf32>
    %362 = arith.addf %361, %360 : vector<64x1xf32>
    %363 = math.log %362 : vector<64x1xf32>
    %364 = arith.addf %356, %363 : vector<64x1xf32>
    %cst_52 = arith.constant 0.000000e+00 : f32
    %365 = vector.broadcast %cst_52 : f32 to vector<64x1xf32>
    %366 = arith.subf %365, %364 : vector<64x1xf32>
    %367 = arith.subf %349, %364 : vector<64x1xf32>
    %c0_53 = arith.constant 0 : index
    %c0_54 = arith.constant 0 : index
    %368 = vector.load %arg8[%c0_53, %c0_54] : memref<64x2xf32, #tpu.memory_space<vmem>>, vector<64x2xf32>
    %c0_55 = arith.constant 0 : index
    %c0_56 = arith.constant 0 : index
    %369 = vector.load %arg9[%c0_55, %c0_56] : memref<64x1xf32, #tpu.memory_space<vmem>>, vector<64x1xf32>
    %370 = vector.extract_strided_slice %368 {offsets = [0, 0], sizes = [64, 1], strides = [1, 1]} : vector<64x2xf32> to vector<64x1xf32>
    %371 = arith.mulf %370, %366 : vector<64x1xf32>
    %372 = vector.extract_strided_slice %368 {offsets = [0, 1], sizes = [64, 1], strides = [1, 1]} : vector<64x2xf32> to vector<64x1xf32>
    %373 = arith.mulf %372, %367 : vector<64x1xf32>
    %374 = arith.addf %371, %373 : vector<64x1xf32>
    %375 = arith.mulf %374, %369 : vector<64x1xf32>
    %376 = vector.extract_strided_slice %375 {offsets = [0, 0], sizes = [8, 1], strides = [1, 1]} : vector<64x1xf32> to vector<8x1xf32>
    %377 = vector.extract_strided_slice %369 {offsets = [0, 0], sizes = [8, 1], strides = [1, 1]} : vector<64x1xf32> to vector<8x1xf32>
    %378 = vector.extract_strided_slice %375 {offsets = [8, 0], sizes = [8, 1], strides = [1, 1]} : vector<64x1xf32> to vector<8x1xf32>
    %379 = arith.addf %376, %378 : vector<8x1xf32>
    %380 = vector.extract_strided_slice %369 {offsets = [8, 0], sizes = [8, 1], strides = [1, 1]} : vector<64x1xf32> to vector<8x1xf32>
    %381 = arith.addf %377, %380 : vector<8x1xf32>
    %382 = vector.extract_strided_slice %375 {offsets = [16, 0], sizes = [8, 1], strides = [1, 1]} : vector<64x1xf32> to vector<8x1xf32>
    %383 = arith.addf %379, %382 : vector<8x1xf32>
    %384 = vector.extract_strided_slice %369 {offsets = [16, 0], sizes = [8, 1], strides = [1, 1]} : vector<64x1xf32> to vector<8x1xf32>
    %385 = arith.addf %381, %384 : vector<8x1xf32>
    %386 = vector.extract_strided_slice %375 {offsets = [24, 0], sizes = [8, 1], strides = [1, 1]} : vector<64x1xf32> to vector<8x1xf32>
    %387 = arith.addf %383, %386 : vector<8x1xf32>
    %388 = vector.extract_strided_slice %369 {offsets = [24, 0], sizes = [8, 1], strides = [1, 1]} : vector<64x1xf32> to vector<8x1xf32>
    %389 = arith.addf %385, %388 : vector<8x1xf32>
    %390 = vector.extract_strided_slice %375 {offsets = [32, 0], sizes = [8, 1], strides = [1, 1]} : vector<64x1xf32> to vector<8x1xf32>
    %391 = arith.addf %387, %390 : vector<8x1xf32>
    %392 = vector.extract_strided_slice %369 {offsets = [32, 0], sizes = [8, 1], strides = [1, 1]} : vector<64x1xf32> to vector<8x1xf32>
    %393 = arith.addf %389, %392 : vector<8x1xf32>
    %394 = vector.extract_strided_slice %375 {offsets = [40, 0], sizes = [8, 1], strides = [1, 1]} : vector<64x1xf32> to vector<8x1xf32>
    %395 = arith.addf %391, %394 : vector<8x1xf32>
    %396 = vector.extract_strided_slice %369 {offsets = [40, 0], sizes = [8, 1], strides = [1, 1]} : vector<64x1xf32> to vector<8x1xf32>
    %397 = arith.addf %393, %396 : vector<8x1xf32>
    %398 = vector.extract_strided_slice %375 {offsets = [48, 0], sizes = [8, 1], strides = [1, 1]} : vector<64x1xf32> to vector<8x1xf32>
    %399 = arith.addf %395, %398 : vector<8x1xf32>
    %400 = vector.extract_strided_slice %369 {offsets = [48, 0], sizes = [8, 1], strides = [1, 1]} : vector<64x1xf32> to vector<8x1xf32>
    %401 = arith.addf %397, %400 : vector<8x1xf32>
    %402 = vector.extract_strided_slice %375 {offsets = [56, 0], sizes = [8, 1], strides = [1, 1]} : vector<64x1xf32> to vector<8x1xf32>
    %403 = arith.addf %399, %402 : vector<8x1xf32>
    %404 = vector.extract_strided_slice %369 {offsets = [56, 0], sizes = [8, 1], strides = [1, 1]} : vector<64x1xf32> to vector<8x1xf32>
    %405 = arith.addf %401, %404 : vector<8x1xf32>
    %cst_57 = arith.constant 9.99999997E-7 : f32
    %406 = vector.broadcast %cst_57 : f32 to vector<8x1xf32>
    %407 = arith.maximumf %405, %406 : vector<8x1xf32>
    %408 = tpu.reciprocal %407 {approx = true} : vector<8x1xf32> -> vector<8x1xf32>
    %409 = arith.mulf %403, %408 : vector<8x1xf32>
    %cst_58 = arith.constant 0.000000e+00 : f32
    %410 = vector.broadcast %cst_58 : f32 to vector<8x1xf32>
    %411 = arith.subf %410, %409 : vector<8x1xf32>
    %c0_59 = arith.constant 0 : index
    %c0_60 = arith.constant 0 : index
    %412 = vector.load %arg10[%c0_59, %c0_60] : memref<8x1xf32, #tpu.memory_space<vmem>>, vector<8x1xf32>
    tpu.vector_store %arg10[%c0_59, %c0_60], %411 {strides = array<i32>} : memref<8x1xf32, #tpu.memory_space<vmem>>, vector<8x1xf32>,
    %c0_61 = arith.constant 0 : index
    %c0_62 = arith.constant 0 : index
    %413 = vector.load %arg11[%c0_61, %c0_62] : memref<64x1xf32, #tpu.memory_space<vmem>>, vector<64x1xf32>
    tpu.vector_store %arg11[%c0_61, %c0_62], %354 {strides = array<i32>} : memref<64x1xf32, #tpu.memory_space<vmem>>, vector<64x1xf32>,
    return
  }
}

</mosaic_0001>

<bundles_post_ra>
// kernel: tpu_custom_call.1
= control target key start
LH: loop header
LB: loop body
LE: loop exit
PB: predicated region body
PF: predicated region fallthrough
CT: control target
= control target key end

     0   :  { %vm92_vm0 = vcmask 130048   ;;  %v2117_v20 = vmov 0   ;;  %vm224_vm1 = vcmask 261120   ;;  %v2119_v63 = vmov 0.0   ;;  %s2121_s30 = smov 1   ;;  %s2122_s18 = smov 127   ;;  %s2725_s1 = inlined_call_operand.vmem [shape: bf16[16,128], index: 1, kind: input, shape index: {}]   ;;  %s2726_s0 = inlined_call_operand.vmem [shape: bf16[64,16], index: 0, kind: input, shape index: {}]   ;;  %s2727_s4 = inlined_call_operand.vmem [shape: f32[1,128], index: 4, kind: input, shape index: {}]   ;;  %s2728_s2 = inlined_call_operand.vmem [shape: bf16[32,256], index: 2, kind: input, shape index: {}]   ;;  %s2729_s5 = inlined_call_operand.vmem [shape: f32[1,128], index: 5, kind: input, shape index: {}]   ;;  %s2730_s3 = inlined_call_operand.vmem [shape: bf16[32,128], index: 3, kind: input, shape index: {}]   ;;  %s2731_s6 = inlined_call_operand.vmem [shape: bf16[32,1], index: 6, kind: input, shape index: {}]   ;;  %s2732_s7 = inlined_call_operand.<no memory space> [shape: f32[1,1], index: 7, kind: input, shape index: {}]   ;;  %s2733_s11 = inlined_call_operand.vmem [shape: f32[64,1], index: 11, kind: output, shape index: {1}]   ;;  %s2734_s8 = inlined_call_operand.vmem [shape: f32[64,2], index: 8, kind: input, shape index: {}]   ;;  %s2735_s9 = inlined_call_operand.vmem [shape: f32[64,1], index: 9, kind: input, shape index: {}]   ;;  %s2736_s10 = inlined_call_operand.vmem [shape: f32[8,1], index: 10, kind: output, shape index: {0}]  }
   0x1   :  { %v1907_v0 = vld [vmem:[%s2725_s1] sm:$0xff]   ;;  %v1909_v2 = vld [vmem:[%s2726_s0 + $0x8] sm:$0xff]   ;;  %s2116_s1 = smov 32   ;;  %v1913_v17 = vld [vmem:[%s2726_s0 + $0x10] sm:$0xff]   ;;  %358 = vmatprep.mubr.bf16.mxu1 %v2117_v20  ;;  %vm2120_vm2 = vmmov 0   ;;  %vm1709_vm3 = vcmask 7168  }
   0x2   :  { %v1908_v1 = vld [vmem:[%s2726_s0] sm:$0xff]   ;;  %1822 = vmatprep.subr.bf16.mxu0 %v1907_v0  ;;  %v1914_v18 = vld [vmem:[%s2726_s0 + $0x18] sm:$0xff]  }
   0x3   :  { %1823 = vmatpush3.bf16.msra.mxu0 %v1907_v0  ;;  %1824 = vmatprep.mubr.msk.bf16.mxu0 %vm92_vm0, %v1908_v1  ;;  %v2199_v4 = vld [vmem:[%s2727_s4] ss:$0 sm:$0xff]  ;;  %v2216_v19 = vld [vmem:[%s2728_s2 + $0x14] ss:$8 sps:$4 sm:$0xff]   ;;  %v2222_v21 = vld [vmem:[%s2728_s2 + $0x10] ss:$8 sps:$4 sm:$0xff]  }
   0x4   :  { %240 = vmatprep.subr.bf16.mxu0 %v2216_v19  ;;  %v2230_v22 = vld [vmem:[%s2728_s2 + $0x4] ss:$8 sps:$4 sm:$0xff]   ;;  %v2236_v23 = vld [vmem:[%s2728_s2] ss:$8 sps:$4 sm:$0xff]   ;;  %338 = vmatprep.subr.bf16.mxu1 %v2216_v19  ;;  %s2118_s2 = smov 64  }
   0x5   :  { %339 = vmatpush1.bf16.msra.mxu1 %v2222_v21  ;;  %v2263_v37 = vld [vmem:[%s2729_s5] ss:$0 sm:$0xff]  ;;  %v2281_v0 = vld [vmem:[%s2730_s3 + $0x8] sm:$0xff]  }
   0x6   :  { %1825 = vmatmul.mubr.msk.bf16.vlgmr.msra.gmra.mxu0 %vm92_vm0, %v1909_v2  ;;  %340 = vmatprep.subr.bf16.mxu1 %v2230_v22  ;;  %v2287_v1 = vld [vmem:[%s2730_s3] sm:$0xff]  }
   0x7   :  { %1828 = vmatprep.mubr.msk.bf16.mxu0 %vm92_vm0, %v1913_v17  ;;  %241 = vmatpush1.bf16.msra.mxu0 %v2222_v21 }
   0x8   :  { %242 = vmatprep.subr.bf16.mxu0 %v2230_v22 }
   0x9   :  { %341 = vmatpush1.bf16.msra.mxu1 %v2236_v23 }
   0xa   :  { %496 = vmatprep.subr.bf16.mxu1 %v2216_v19 }
   0xb   :  { %243 = vmatpush1.bf16.msra.mxu0 %v2236_v23 }
   0xc   :  { %1832 = vmatprep.subr.bf16.mxu0 %v2119_v63 }
   0xe   :  { %1829 = vmatmul.mubr.msk.bf16.gmra.mxu0 %vm92_vm0, %v1914_v18 }
   0xf   :  { %260 = vmatprep.mubr.bf16.mxu0 %v2117_v20 }
  0xc6   :  { %v2194_v3 = vpop.f32.mrf.mxu0 }
  0xc8   :  { %v139_v5 = vpop.f32.mrf.mxu0 }
  0xc9   :  { %v140_v6 = vadd.f32 %v2199_v4, %v139_v5 }
  0xca   :  { %v2249_v29 = vpop.f32.mrf.mxu0 }
  0xcb   :  { %1922 = vtanh.f32 %v140_v6  ;;  %v1738_v8 = vmul.f32 -1.442695, %v140_v6 }
  0xcc   :  { %v142_v30 = vpop.f32.mrf.mxu0 }
  0xcd   :  { %1924 = vpow2.f32 %v1738_v8  ;;  %v143_v35 = vadd.f32 %v2199_v4, %v142_v30 }
  0xce   :  { %v2251_v31 = vpop.f32.mrf.mxu0 }
  0xd0   :  { %v2253_v32 = vpop.f32.mrf.mxu0 }
  0xd2   :  { %v2255_v33 = vpop.f32.mrf.mxu0 }
  0xd4   :  { %v2257_v34 = vpop.f32.mrf.mxu0 }
  0xd8   :  { %v1923_v7 = vpop.eup %1922 }
  0xd9   :  { %185 = vrot.lane.b32.xlu0 %v1923_v7, %s2116_s1 }
  0xda   :  { %v1925_v9 = vpop.eup %1924 }
  0xdb   :  { %v179_v10 = vadd.f32 1.0, %v1925_v9 }
  0xdd   :  { %1926 = vrcp.f32 %v179_v10 }
  0xea   :  { %v1927_v11 = vpop.eup %1926 }
  0xeb   :  { %v183_v14 = vmul.f32 0.0, %v1927_v11 }
 0x14b   :  { %v186_v12 = vpop.permute.xlu0 %185 }
 0x14c   :  { %v188_v13 = vmul.f32 %v1927_v11, %v186_v12 }
 0x14e   :  { %190 = vrot.lane.b32.xlu0 %v188_v13, %s2116_s1 }
 0x1c0   :  { %v191_v15 = vpop.permute.xlu0 %190 }
 0x1c1   :  { %v2204_v16 = vadd.f32 %v191_v15, %v183_v14  ;;  %v148_v14 = vadd.f32 %v2194_v3, %v2199_v4 }
 0x1c3   :  { %1928 = vtanh.f32 %v2204_v16 }
 0x1d0   :  { %v1929_v24 = vpop.eup %1928 }
 0x1d1   :  { %196 = vrot.lane.b32.xlu1 %v1929_v24, %s2116_s1 }
 0x243   :  { %v197_v25 = vpop.permute.xlu1 %196 }
 0x244   :  { %v199_v26 = vmul.f32 %v1927_v11, %v197_v25 }
 0x246   :  { %v200_v27 = vpack.c.bf16 %v199_v26, %v199_v26 }
 0x248   :  { %202 = vrot.lane.b32.xlu1 %v200_v27, %s2118_s2 }
 0x2ba   :  { %v203_v28 = vpop.permute.xlu1 %202 }
 0x2bb   :  { %1743 = vmatmul.mubr.msk.bf16.vlgmr.msra.gmra.mxu0 %vm224_vm1, %v203_v28 }
 0x2bc   :  { %1833 = vmatpush3.bf16.msra.mxu0 %v2281_v0  ;;  %1836 = vmatprep.mubr.msk.bf16.mxu0 %vm2120_vm2, %v2119_v63 }
 0x2bd   :  { %1834 = vmatprep.subr.bf16.mxu0 %v2119_v63 }
 0x2c0   :  { %1835 = vmatpush3.bf16.msra.mxu0 %v2287_v1 }
 0x2c1   :  { %1840 = vmatprep.subr.bf16.mxu0 %v2119_v63 }
 0x37b   :  { %v262_v36 = vpop.f32.mrf.mxu0 }
 0x37c   :  { %v294_v38 = vadd.f32 %v262_v36, %v143_v35 }
 0x37d   :  { %v264_v39 = vpop.f32.mrf.mxu0 }
 0x37e   :  { %1930 = vtanh.f32 %v294_v38  ;;  %v269_v40 = vadd.f32 %v2263_v37, %v264_v39  ;;  %v1745_v45 = vmul.f32 -1.442695, %v294_v38 }
 0x37f   :  { %v266_v41 = vpop.f32.mrf.mxu0 }
 0x380   :  { %1932 = vtanh.f32 %v269_v40  ;;  %v1744_v46 = vmul.f32 -1.442695, %v269_v40 }
 0x381   :  { %v267_v42 = vpop.f32.mrf.mxu0  ;;  %1934 = vpow2.f32 %v1745_v45 }
 0x382   :  { %1936 = vpow2.f32 %v1744_v46 }
 0x38b   :  { %v1931_v43 = vpop.eup %1930 }
 0x38c   :  { %304 = vrot.lane.b32.xlu0 %v1931_v43, %s2116_s1 }
 0x38d   :  { %v1933_v44 = vpop.eup %1932 }
 0x38e   :  { %279 = vrot.lane.b32.xlu1 %v1933_v44, %s2116_s1  ;;  %v1935_v47 = vpop.eup %1934 }
 0x38f   :  { %v1937_v48 = vpop.eup %1936  ;;  %v298_v49 = vadd.f32 1.0, %v1935_v47 }
 0x390   :  { %v273_v50 = vadd.f32 1.0, %v1937_v48 }
 0x391   :  { %1938 = vrcp.f32 %v298_v49 }
 0x392   :  { %1940 = vrcp.f32 %v273_v50 }
 0x39e   :  { %v1939_v51 = vpop.eup %1938 }
 0x39f   :  { %v1941_v54 = vpop.eup %1940  ;;  %v302_v57 = vmul.f32 %v1939_v51, %v2204_v16 }
 0x3a0   :  { %v277_v60 = vmul.f32 0.0, %v1941_v54 }
 0x3fe   :  { %v305_v52 = vpop.permute.xlu0 %304 }
 0x3ff   :  { %v307_v53 = vmul.f32 %v1939_v51, %v305_v52 }
 0x400   :  { %v280_v55 = vpop.permute.xlu1 %279 }
 0x401   :  { %309 = vrot.lane.b32.xlu0 %v307_v53, %s2116_s1  ;;  %v282_v56 = vmul.f32 %v1941_v54, %v280_v55 }
 0x403   :  { %284 = vrot.lane.b32.xlu1 %v282_v56, %s2116_s1 }
 0x473   :  { %v310_v58 = vpop.permute.xlu0 %309 }
 0x474   :  { %v2271_v59 = vadd.f32 %v310_v58, %v302_v57 }
 0x475   :  { %v285_v61 = vpop.permute.xlu1 %284 }
 0x476   :  { %1942 = vtanh.f32 %v2271_v59  ;;  %v2274_v62 = vadd.f32 %v285_v61, %v277_v60 }
 0x478   :  { %1944 = vtanh.f32 %v2274_v62 }
 0x483   :  { %v1943_v2 = vpop.eup %1942 }
 0x484   :  { %315 = vrot.lane.b32.xlu0 %v1943_v2, %s2116_s1 }
 0x485   :  { %v1945_v5 = vpop.eup %1944 }
 0x486   :  { %290 = vrot.lane.b32.xlu1 %v1945_v5, %s2116_s1 }
 0x4f6   :  { %v316_v6 = vpop.permute.xlu0 %315 }
 0x4f7   :  { %v318_v7 = vmul.f32 %v1939_v51, %v316_v6 }
 0x4f8   :  { %v291_v9 = vpop.permute.xlu1 %290 }
 0x4f9   :  { %v319_v8 = vpack.c.bf16 %v318_v7, %v318_v7  ;;  %v2296_v10 = vmul.f32 %v1941_v54, %v291_v9  ;;  %v151_v7 = vadd.f32 %v2249_v29, %v2199_v4 }
 0x4fb   :  { %321 = vrot.lane.b32.xlu0 %v319_v8, %s2118_s2  ;;  %v367_v11 = vpack.c.bf16 %v2296_v10, %v2296_v10 }
 0x4fd   :  { %369 = vrot.lane.b32.xlu1 %v367_v11, %s2118_s2 }
 0x56d   :  { %v322_v12 = vpop.permute.xlu0 %321 }
 0x56e   :  { %1746 = vmatmul.mubr.msk.bf16.vlgmr.msra.gmra.mxu1 %vm224_vm1, %v322_v12 }
 0x56f   :  { %497 = vmatpush1.bf16.msra.mxu1 %v2222_v21  ;;  %516 = vmatprep.mubr.bf16.mxu1 %v2117_v20  ;;  %v370_v13 = vpop.permute.xlu1 %369 }
 0x570   :  { %498 = vmatprep.subr.bf16.mxu1 %v2230_v22  ;;  %1837 = vmatmul.mubr.msk.bf16.vlgmr.msra.gmra.mxu0 %vm224_vm1, %v370_v13 }
 0x571   :  { %1841 = vmatpush3.bf16.msra.mxu0 %v2281_v0  ;;  %1844 = vmatprep.mubr.msk.bf16.mxu0 %vm2120_vm2, %v2119_v63 }
 0x572   :  { %1842 = vmatprep.subr.bf16.mxu0 %v2119_v63 }
 0x573   :  { %499 = vmatpush1.bf16.msra.mxu1 %v2236_v23 }
 0x574   :  { %642 = vmatprep.subr.bf16.mxu1 %v2216_v19 }
 0x575   :  { %1843 = vmatpush3.bf16.msra.mxu0 %v2287_v1 }
 0x576   :  { %1848 = vmatprep.subr.bf16.mxu0 %v2119_v63 }
 0x62e   :  { %v360_v15 = vpop.f32.mrf.mxu1 }
 0x62f   :  { %v452_v16 = vadd.f32 %v360_v15, %v148_v14 }
 0x630   :  { %v362_v17 = vpop.f32.mrf.mxu1  ;;  %v420_v18 = vpop.f32.mrf.mxu0 }
 0x631   :  { %1946 = vtanh.f32 %v452_v16  ;;  %v426_v24 = vadd.f32 %v420_v18, %v362_v17  ;;  %v1751_v3 = vmul.f32 -1.442695, %v452_v16 }
 0x632   :  { %v364_v25 = vpop.f32.mrf.mxu1  ;;  %v1838_v26 = vpop.f32.mrf.mxu0 }
 0x633   :  { %v427_v27 = vadd.f32 %v2263_v37, %v426_v24 }
 0x634   :  { %v365_v28 = vpop.f32.mrf.mxu1  ;;  %v423_v30 = vpop.f32.mrf.mxu0 }
 0x635   :  { %1948 = vtanh.f32 %v427_v27  ;;  %v1750_v39 = vmul.f32 -1.442695, %v427_v27 }
 0x636   :  { %v1839_v35 = vpop.f32.mrf.mxu0  ;;  %1950 = vpow2.f32 %v1751_v3 }
 0x637   :  { %1952 = vpow2.f32 %v1750_v39 }
 0x63e   :  { %v1947_v36 = vpop.eup %1946 }
 0x63f   :  { %462 = vrot.lane.b32.xlu0 %v1947_v36, %s2116_s1 }
 0x642   :  { %v1949_v38 = vpop.eup %1948 }
 0x643   :  { %437 = vrot.lane.b32.xlu1 %v1949_v38, %s2116_s1  ;;  %v1951_v40 = vpop.eup %1950 }
 0x644   :  { %v456_v41 = vadd.f32 1.0, %v1951_v40  ;;  %v1953_v42 = vpop.eup %1952 }
 0x645   :  { %v431_v43 = vadd.f32 1.0, %v1953_v42 }
 0x646   :  { %1954 = vrcp.f32 %v456_v41 }
 0x647   :  { %1956 = vrcp.f32 %v431_v43 }
 0x653   :  { %v1955_v44 = vpop.eup %1954 }
 0x654   :  { %v1957_v47 = vpop.eup %1956  ;;  %v460_v50 = vmul.f32 %v1955_v44, %v2271_v59 }
 0x655   :  { %v435_v53 = vmul.f32 %v1957_v47, %v2274_v62 }
 0x6b1   :  { %v463_v45 = vpop.permute.xlu0 %462 }
 0x6b2   :  { %v465_v46 = vmul.f32 %v1955_v44, %v463_v45 }
 0x6b4   :  { %467 = vrot.lane.b32.xlu0 %v465_v46, %s2116_s1 }
 0x6b5   :  { %v438_v48 = vpop.permute.xlu1 %437 }
 0x6b6   :  { %v440_v49 = vmul.f32 %v1957_v47, %v438_v48 }
 0x6b8   :  { %442 = vrot.lane.b32.xlu1 %v440_v49, %s2116_s1 }
 0x726   :  { %v468_v51 = vpop.permute.xlu0 %467 }
 0x727   :  { %v2323_v52 = vadd.f32 %v468_v51, %v460_v50 }
 0x729   :  { %1958 = vtanh.f32 %v2323_v52 }
 0x72a   :  { %v443_v54 = vpop.permute.xlu1 %442 }
 0x72b   :  { %v2327_v55 = vadd.f32 %v443_v54, %v435_v53 }
 0x72d   :  { %1960 = vtanh.f32 %v2327_v55 }
 0x736   :  { %v1959_v56 = vpop.eup %1958 }
 0x737   :  { %473 = vrot.lane.b32.xlu0 %v1959_v56, %s2116_s1 }
 0x73a   :  { %v1961_v57 = vpop.eup %1960 }
 0x73b   :  { %448 = vrot.lane.b32.xlu1 %v1961_v57, %s2116_s1 }
 0x7a9   :  { %v474_v58 = vpop.permute.xlu0 %473 }
 0x7aa   :  { %v476_v59 = vmul.f32 %v1955_v44, %v474_v58 }
 0x7ac   :  { %v477_v60 = vpack.c.bf16 %v476_v59, %v476_v59  ;;  %v156_v59 = vadd.f32 %v2199_v4, %v2253_v32 }
 0x7ad   :  { %v449_v61 = vpop.permute.xlu1 %448 }
 0x7ae   :  { %479 = vrot.lane.b32.xlu0 %v477_v60, %s2118_s2  ;;  %v2333_v2 = vmul.f32 %v1957_v47, %v449_v61 }
 0x7b0   :  { %v525_v62 = vpack.c.bf16 %v2333_v2, %v2333_v2 }
 0x7b2   :  { %527 = vrot.lane.b32.xlu1 %v525_v62, %s2118_s2 }
 0x820   :  { %v480_v5 = vpop.permute.xlu0 %479 }
 0x821   :  { %1752 = vmatmul.mubr.msk.bf16.vlgmr.msra.gmra.mxu1 %vm224_vm1, %v480_v5 }
 0x822   :  { %643 = vmatpush1.bf16.msra.mxu1 %v2222_v21  ;;  %662 = vmatprep.mubr.bf16.mxu1 %v2117_v20 }
 0x823   :  { %644 = vmatprep.subr.bf16.mxu1 %v2230_v22 }
 0x824   :  { %v528_v6 = vpop.permute.xlu1 %527 }
 0x825   :  { %1845 = vmatmul.mubr.msk.bf16.vlgmr.msra.gmra.mxu0 %vm224_vm1, %v528_v6 }
 0x826   :  { %645 = vmatpush1.bf16.msra.mxu1 %v2236_v23  ;;  %1849 = vmatpush3.bf16.msra.mxu0 %v2281_v0 }
 0x827   :  { %1852 = vmatprep.mubr.msk.bf16.mxu0 %vm2120_vm2, %v2119_v63  ;;  %1850 = vmatprep.subr.bf16.mxu0 %v2119_v63 }
 0x828   :  { %788 = vmatprep.subr.bf16.mxu1 %v2216_v19 }
 0x82a   :  { %1851 = vmatpush3.bf16.msra.mxu0 %v2287_v1 }
 0x82b   :  { %1856 = vmatprep.subr.bf16.mxu0 %v2119_v63 }
 0x8e1   :  { %v518_v8 = vpop.f32.mrf.mxu1 }
 0x8e2   :  { %v598_v9 = vadd.f32 %v518_v8, %v151_v7 }
 0x8e3   :  { %v520_v11 = vpop.f32.mrf.mxu1 }
 0x8e4   :  { %1962 = vtanh.f32 %v598_v9  ;;  %v1755_v29 = vmul.f32 -1.442695, %v598_v9 }
 0x8e5   :  { %v522_v12 = vpop.f32.mrf.mxu1  ;;  %v566_v13 = vpop.f32.mrf.mxu0 }
 0x8e6   :  { %v572_v14 = vadd.f32 %v566_v13, %v520_v11 }
 0x8e7   :  { %v523_v15 = vpop.f32.mrf.mxu1  ;;  %v1846_v16 = vpop.f32.mrf.mxu0 }
 0x8e8   :  { %v573_v17 = vadd.f32 %v2263_v37, %v572_v14 }
 0x8e9   :  { %v569_v18 = vpop.f32.mrf.mxu0 }
 0x8ea   :  { %1964 = vtanh.f32 %v573_v17  ;;  %v1754_v27 = vmul.f32 -1.442695, %v573_v17 }
 0x8eb   :  { %v1847_v24 = vpop.f32.mrf.mxu0  ;;  %1966 = vpow2.f32 %v1755_v29 }
 0x8ec   :  { %1968 = vpow2.f32 %v1754_v27 }
 0x8f1   :  { %v1963_v25 = vpop.eup %1962 }
 0x8f2   :  { %608 = vrot.lane.b32.xlu0 %v1963_v25, %s2116_s1 }
 0x8f7   :  { %v1965_v26 = vpop.eup %1964 }
 0x8f8   :  { %583 = vrot.lane.b32.xlu1 %v1965_v26, %s2116_s1  ;;  %v1967_v28 = vpop.eup %1966 }
 0x8f9   :  { %v602_v30 = vadd.f32 1.0, %v1967_v28  ;;  %v1969_v35 = vpop.eup %1968 }
 0x8fa   :  { %v577_v36 = vadd.f32 1.0, %v1969_v35 }
 0x8fb   :  { %1970 = vrcp.f32 %v602_v30 }
 0x8fc   :  { %1972 = vrcp.f32 %v577_v36 }
 0x908   :  { %v1971_v38 = vpop.eup %1970 }
 0x909   :  { %v1973_v40 = vpop.eup %1972  ;;  %v606_v43 = vmul.f32 %v1971_v38, %v2323_v52 }
 0x90a   :  { %v581_v46 = vmul.f32 %v1973_v40, %v2327_v55 }
 0x964   :  { %v609_v3 = vpop.permute.xlu0 %608 }
 0x965   :  { %v611_v39 = vmul.f32 %v1971_v38, %v609_v3 }
 0x967   :  { %613 = vrot.lane.b32.xlu0 %v611_v39, %s2116_s1 }
 0x96a   :  { %v584_v41 = vpop.permute.xlu1 %583 }
 0x96b   :  { %v586_v42 = vmul.f32 %v1973_v40, %v584_v41 }
 0x96d   :  { %588 = vrot.lane.b32.xlu1 %v586_v42, %s2116_s1 }
 0x9d9   :  { %v614_v44 = vpop.permute.xlu0 %613 }
 0x9da   :  { %v2359_v45 = vadd.f32 %v614_v44, %v606_v43 }
 0x9dc   :  { %1974 = vtanh.f32 %v2359_v45 }
 0x9df   :  { %v589_v47 = vpop.permute.xlu1 %588 }
 0x9e0   :  { %v2363_v48 = vadd.f32 %v589_v47, %v581_v46 }
 0x9e2   :  { %1976 = vtanh.f32 %v2363_v48 }
 0x9e9   :  { %v1975_v49 = vpop.eup %1974 }
 0x9ea   :  { %619 = vrot.lane.b32.xlu0 %v1975_v49, %s2116_s1 }
 0x9ef   :  { %v1977_v50 = vpop.eup %1976 }
 0x9f0   :  { %594 = vrot.lane.b32.xlu1 %v1977_v50, %s2116_s1 }
 0xa5c   :  { %v620_v51 = vpop.permute.xlu0 %619 }
 0xa5d   :  { %v622_v52 = vmul.f32 %v1971_v38, %v620_v51 }
 0xa5f   :  { %v623_v53 = vpack.c.bf16 %v622_v52, %v622_v52  ;;  %v159_v52 = vadd.f32 %v2199_v4, %v2257_v34 }
 0xa61   :  { %625 = vrot.lane.b32.xlu0 %v623_v53, %s2118_s2 }
 0xa62   :  { %v595_v54 = vpop.permute.xlu1 %594 }
 0xa63   :  { %v2369_v56 = vmul.f32 %v1973_v40, %v595_v54 }
 0xa65   :  { %v671_v55 = vpack.c.bf16 %v2369_v56, %v2369_v56 }
 0xa67   :  { %673 = vrot.lane.b32.xlu1 %v671_v55, %s2118_s2 }
 0xad3   :  { %v626_v57 = vpop.permute.xlu0 %625 }
 0xad4   :  { %1756 = vmatmul.mubr.msk.bf16.vlgmr.msra.gmra.mxu1 %vm224_vm1, %v626_v57 }
 0xad5   :  { %789 = vmatpush1.bf16.msra.mxu1 %v2222_v21  ;;  %808 = vmatprep.mubr.bf16.mxu1 %v2117_v20 }
 0xad6   :  { %790 = vmatprep.subr.bf16.mxu1 %v2230_v22 }
 0xad9   :  { %791 = vmatpush1.bf16.msra.mxu1 %v2236_v23  ;;  %v674_v58 = vpop.permute.xlu1 %673 }
 0xada   :  { %934 = vmatprep.subr.bf16.mxu1 %v2216_v19  ;;  %1853 = vmatmul.mubr.msk.bf16.vlgmr.msra.gmra.mxu0 %vm224_vm1, %v674_v58 }
 0xadb   :  { %1857 = vmatpush3.bf16.msra.mxu0 %v2281_v0  ;;  %1860 = vmatprep.mubr.msk.bf16.mxu0 %vm2120_vm2, %v2119_v63 }
 0xadc   :  { %1858 = vmatprep.subr.bf16.mxu0 %v2119_v63 }
 0xadf   :  { %1859 = vmatpush3.bf16.msra.mxu0 %v2287_v1 }
 0xae0   :  { %1864 = vmatprep.subr.bf16.mxu0 %v2119_v63 }
 0xb94   :  { %v664_v60 = vpop.f32.mrf.mxu1 }
 0xb95   :  { %v744_v61 = vadd.f32 %v664_v60, %v156_v59 }
 0xb96   :  { %v666_v62 = vpop.f32.mrf.mxu1 }
 0xb97   :  { %1978 = vtanh.f32 %v744_v61  ;;  %v1759_v32 = vmul.f32 -1.442695, %v744_v61 }
 0xb98   :  { %v668_v5 = vpop.f32.mrf.mxu1 }
 0xb9a   :  { %v669_v6 = vpop.f32.mrf.mxu1  ;;  %v712_v7 = vpop.f32.mrf.mxu0 }
 0xb9b   :  { %v718_v8 = vadd.f32 %v712_v7, %v666_v62 }
 0xb9c   :  { %v1854_v9 = vpop.f32.mrf.mxu0 }
 0xb9d   :  { %v719_v11 = vadd.f32 %v2263_v37, %v718_v8 }
 0xb9e   :  { %v715_v12 = vpop.f32.mrf.mxu0 }
 0xb9f   :  { %1980 = vtanh.f32 %v719_v11  ;;  %v1758_v16 = vmul.f32 -1.442695, %v719_v11 }
 0xba0   :  { %v1855_v13 = vpop.f32.mrf.mxu0  ;;  %1982 = vpow2.f32 %v1759_v32 }
 0xba1   :  { %1984 = vpow2.f32 %v1758_v16 }
 0xba4   :  { %v1979_v14 = vpop.eup %1978 }
 0xba5   :  { %754 = vrot.lane.b32.xlu0 %v1979_v14, %s2116_s1 }
 0xbac   :  { %v1981_v15 = vpop.eup %1980 }
 0xbad   :  { %729 = vrot.lane.b32.xlu1 %v1981_v15, %s2116_s1  ;;  %v1983_v17 = vpop.eup %1982 }
 0xbae   :  { %v748_v18 = vadd.f32 1.0, %v1983_v17  ;;  %v1985_v24 = vpop.eup %1984 }
 0xbaf   :  { %v723_v25 = vadd.f32 1.0, %v1985_v24 }
 0xbb0   :  { %1986 = vrcp.f32 %v748_v18 }
 0xbb1   :  { %1988 = vrcp.f32 %v723_v25 }
 0xbbd   :  { %v1987_v26 = vpop.eup %1986 }
 0xbbe   :  { %v1989_v28 = vpop.eup %1988  ;;  %v752_v36 = vmul.f32 %v1987_v26, %v2359_v45 }
 0xbbf   :  { %v727_v39 = vmul.f32 %v1989_v28, %v2363_v48 }
 0xc17   :  { %v755_v29 = vpop.permute.xlu0 %754 }
 0xc18   :  { %v757_v27 = vmul.f32 %v1987_v26, %v755_v29 }
 0xc1a   :  { %759 = vrot.lane.b32.xlu0 %v757_v27, %s2116_s1 }
 0xc1f   :  { %v730_v30 = vpop.permute.xlu1 %729 }
 0xc20   :  { %v732_v35 = vmul.f32 %v1989_v28, %v730_v30 }
 0xc22   :  { %734 = vrot.lane.b32.xlu1 %v732_v35, %s2116_s1 }
 0xc8c   :  { %v760_v38 = vpop.permute.xlu0 %759 }
 0xc8d   :  { %v2395_v3 = vadd.f32 %v760_v38, %v752_v36 }
 0xc8f   :  { %1990 = vtanh.f32 %v2395_v3 }
 0xc94   :  { %v735_v40 = vpop.permute.xlu1 %734 }
 0xc95   :  { %v2399_v41 = vadd.f32 %v735_v40, %v727_v39 }
 0xc97   :  { %1992 = vtanh.f32 %v2399_v41 }
 0xc9c   :  { %v1991_v42 = vpop.eup %1990 }
 0xc9d   :  { %765 = vrot.lane.b32.xlu0 %v1991_v42, %s2116_s1 }
 0xca4   :  { %v1993_v43 = vpop.eup %1992 }
 0xca5   :  { %740 = vrot.lane.b32.xlu1 %v1993_v43, %s2116_s1 }
 0xd0f   :  { %v766_v44 = vpop.permute.xlu0 %765 }
 0xd10   :  { %v768_v45 = vmul.f32 %v1987_v26, %v766_v44 }
 0xd12   :  { %v769_v46 = vpack.c.bf16 %v768_v45, %v768_v45  ;;  %v164_v45 = vadd.f32 %v2251_v31, %v2199_v4 }
 0xd14   :  { %771 = vrot.lane.b32.xlu0 %v769_v46, %s2118_s2 }
 0xd17   :  { %v741_v47 = vpop.permute.xlu1 %740 }
 0xd18   :  { %v2405_v49 = vmul.f32 %v1989_v28, %v741_v47 }
 0xd1a   :  { %v817_v48 = vpack.c.bf16 %v2405_v49, %v2405_v49 }
 0xd1c   :  { %819 = vrot.lane.b32.xlu1 %v817_v48, %s2118_s2 }
 0xd86   :  { %v772_v50 = vpop.permute.xlu0 %771 }
 0xd87   :  { %1760 = vmatmul.mubr.msk.bf16.vlgmr.msra.gmra.mxu1 %vm224_vm1, %v772_v50 }
 0xd88   :  { %935 = vmatpush1.bf16.msra.mxu1 %v2222_v21  ;;  %954 = vmatprep.mubr.bf16.mxu1 %v2117_v20 }
 0xd89   :  { %936 = vmatprep.subr.bf16.mxu1 %v2230_v22 }
 0xd8c   :  { %937 = vmatpush1.bf16.msra.mxu1 %v2236_v23 }
 0xd8d   :  { %1080 = vmatprep.subr.bf16.mxu1 %v2216_v19 }
 0xd8e   :  { %v820_v51 = vpop.permute.xlu1 %819 }
 0xd8f   :  { %1861 = vmatmul.mubr.msk.bf16.vlgmr.msra.gmra.mxu0 %vm224_vm1, %v820_v51 }
 0xd90   :  { %1865 = vmatpush3.bf16.msra.mxu0 %v2281_v0  ;;  %1868 = vmatprep.mubr.msk.bf16.mxu0 %vm2120_vm2, %v2119_v63 }
 0xd91   :  { %1866 = vmatprep.subr.bf16.mxu0 %v2119_v63 }
 0xd94   :  { %1867 = vmatpush3.bf16.msra.mxu0 %v2287_v1 }
 0xd95   :  { %1872 = vmatprep.subr.bf16.mxu0 %v2119_v63 }
 0xe47   :  { %v810_v53 = vpop.f32.mrf.mxu1 }
 0xe48   :  { %v890_v54 = vadd.f32 %v810_v53, %v159_v52 }
 0xe49   :  { %v812_v55 = vpop.f32.mrf.mxu1 }
 0xe4a   :  { %1994 = vtanh.f32 %v890_v54  ;;  %v1763_v34 = vmul.f32 -1.442695, %v890_v54 }
 0xe4b   :  { %v814_v57 = vpop.f32.mrf.mxu1 }
 0xe4d   :  { %v815_v58 = vpop.f32.mrf.mxu1 }
 0xe4f   :  { %v858_v59 = vpop.f32.mrf.mxu0 }
 0xe50   :  { %v864_v60 = vadd.f32 %v858_v59, %v812_v55 }
 0xe51   :  { %v1862_v61 = vpop.f32.mrf.mxu0 }
 0xe52   :  { %v865_v62 = vadd.f32 %v2263_v37, %v864_v60 }
 0xe53   :  { %v861_v5 = vpop.f32.mrf.mxu0 }
 0xe54   :  { %1996 = vtanh.f32 %v865_v62  ;;  %v1762_v9 = vmul.f32 -1.442695, %v865_v62 }
 0xe55   :  { %v1863_v6 = vpop.f32.mrf.mxu0  ;;  %1998 = vpow2.f32 %v1763_v34 }
 0xe56   :  { %2000 = vpow2.f32 %v1762_v9 }
 0xe57   :  { %v1995_v7 = vpop.eup %1994 }
 0xe58   :  { %900 = vrot.lane.b32.xlu0 %v1995_v7, %s2116_s1 }
 0xe61   :  { %v1997_v8 = vpop.eup %1996 }
 0xe62   :  { %875 = vrot.lane.b32.xlu1 %v1997_v8, %s2116_s1  ;;  %v1999_v11 = vpop.eup %1998 }
 0xe63   :  { %v894_v12 = vadd.f32 1.0, %v1999_v11  ;;  %v2001_v13 = vpop.eup %2000 }
 0xe64   :  { %v869_v14 = vadd.f32 1.0, %v2001_v13 }
 0xe65   :  { %2002 = vrcp.f32 %v894_v12 }
 0xe66   :  { %2004 = vrcp.f32 %v869_v14 }
 0xe72   :  { %v2003_v15 = vpop.eup %2002 }
 0xe73   :  { %v2005_v17 = vpop.eup %2004  ;;  %v898_v25 = vmul.f32 %v2003_v15, %v2395_v3 }
 0xe74   :  { %v873_v27 = vmul.f32 %v2005_v17, %v2399_v41 }
 0xeca   :  { %v901_v32 = vpop.permute.xlu0 %900 }
 0xecb   :  { %v903_v16 = vmul.f32 %v2003_v15, %v901_v32 }
 0xecd   :  { %905 = vrot.lane.b32.xlu0 %v903_v16, %s2116_s1 }
 0xed4   :  { %v876_v18 = vpop.permute.xlu1 %875 }
 0xed5   :  { %v878_v24 = vmul.f32 %v2005_v17, %v876_v18 }
 0xed7   :  { %880 = vrot.lane.b32.xlu1 %v878_v24, %s2116_s1 }
 0xf3f   :  { %v906_v26 = vpop.permute.xlu0 %905 }
 0xf40   :  { %v2431_v29 = vadd.f32 %v906_v26, %v898_v25 }
 0xf42   :  { %2006 = vtanh.f32 %v2431_v29 }
 0xf49   :  { %v881_v28 = vpop.permute.xlu1 %880 }
 0xf4a   :  { %v2435_v30 = vadd.f32 %v881_v28, %v873_v27 }
 0xf4c   :  { %2008 = vtanh.f32 %v2435_v30 }
 0xf4f   :  { %v2007_v35 = vpop.eup %2006 }
 0xf50   :  { %911 = vrot.lane.b32.xlu0 %v2007_v35, %s2116_s1 }
 0xf59   :  { %v2009_v36 = vpop.eup %2008 }
 0xf5a   :  { %886 = vrot.lane.b32.xlu1 %v2009_v36, %s2116_s1 }
 0xfc2   :  { %v912_v38 = vpop.permute.xlu0 %911 }
 0xfc3   :  { %v914_v3 = vmul.f32 %v2003_v15, %v912_v38 }
 0xfc5   :  { %v915_v39 = vpack.c.bf16 %v914_v3, %v914_v3 }
 0xfc7   :  { %917 = vrot.lane.b32.xlu0 %v915_v39, %s2118_s2 }
 0xfcc   :  { %v887_v40 = vpop.permute.xlu1 %886 }
 0xfcd   :  { %v2441_v42 = vmul.f32 %v2005_v17, %v887_v40 }
 0xfcf   :  { %v963_v41 = vpack.c.bf16 %v2441_v42, %v2441_v42 }
 0xfd1   :  { %965 = vrot.lane.b32.xlu1 %v963_v41, %s2118_s2 }
0x1039   :  { %v918_v43 = vpop.permute.xlu0 %917 }
0x103a   :  { %1764 = vmatmul.mubr.msk.bf16.vlgmr.msra.gmra.mxu1 %vm224_vm1, %v918_v43 }
0x103b   :  { %1081 = vmatpush1.bf16.msra.mxu1 %v2222_v21  ;;  %1100 = vmatprep.mubr.bf16.mxu1 %v2117_v20 }
0x103c   :  { %1082 = vmatprep.subr.bf16.mxu1 %v2230_v22 }
0x103f   :  { %1083 = vmatpush1.bf16.msra.mxu1 %v2236_v23 }
0x1040   :  { %1226 = vmatprep.subr.bf16.mxu1 %v2216_v19 }
0x1043   :  { %v966_v44 = vpop.permute.xlu1 %965 }
0x1044   :  { %1869 = vmatmul.mubr.msk.bf16.vlgmr.msra.gmra.mxu0 %vm224_vm1, %v966_v44 }
0x1045   :  { %1873 = vmatpush3.bf16.msra.mxu0 %v2281_v0  ;;  %1876 = vmatprep.mubr.msk.bf16.mxu0 %vm2120_vm2, %v2119_v63 }
0x1046   :  { %1874 = vmatprep.subr.bf16.mxu0 %v2119_v63 }
0x1049   :  { %1875 = vmatpush3.bf16.msra.mxu0 %v2287_v1 }
0x104a   :  { %1880 = vmatprep.subr.bf16.mxu0 %v2119_v63 }
0x10fa   :  { %v956_v46 = vpop.f32.mrf.mxu1 }
0x10fb   :  { %v1036_v47 = vadd.f32 %v956_v46, %v164_v45 }
0x10fc   :  { %v958_v19 = vpop.f32.mrf.mxu1 }
0x10fd   :  { %2010 = vtanh.f32 %v1036_v47  ;;  %v1767_v31 = vmul.f32 -1.442695, %v1036_v47 }
0x10fe   :  { %v960_v48 = vpop.f32.mrf.mxu1 }
0x1100   :  { %v961_v50 = vpop.f32.mrf.mxu1 }
0x1104   :  { %v1004_v51 = vpop.f32.mrf.mxu0 }
0x1105   :  { %v1010_v52 = vadd.f32 %v1004_v51, %v958_v19 }
0x1106   :  { %v1870_v53 = vpop.f32.mrf.mxu0 }
0x1107   :  { %v1011_v54 = vadd.f32 %v2263_v37, %v1010_v52 }
0x1108   :  { %v1007_v55 = vpop.f32.mrf.mxu0 }
0x1109   :  { %2012 = vtanh.f32 %v1011_v54  ;;  %v1766_v60 = vmul.f32 -1.442695, %v1011_v54 }
0x110a   :  { %v2011_v57 = vpop.eup %2010  ;;  %v1871_v58 = vpop.f32.mrf.mxu0  ;;  %2014 = vpow2.f32 %v1767_v31 }
0x110b   :  { %1046 = vrot.lane.b32.xlu0 %v2011_v57, %s2116_s1  ;;  %2016 = vpow2.f32 %v1766_v60 }
0x1116   :  { %v2013_v59 = vpop.eup %2012 }
0x1117   :  { %1021 = vrot.lane.b32.xlu1 %v2013_v59, %s2116_s1  ;;  %v2015_v61 = vpop.eup %2014 }
0x1118   :  { %v1040_v62 = vadd.f32 1.0, %v2015_v61  ;;  %v2017_v5 = vpop.eup %2016 }
0x1119   :  { %v1015_v6 = vadd.f32 1.0, %v2017_v5 }
0x111a   :  { %2018 = vrcp.f32 %v1040_v62 }
0x111b   :  { %2020 = vrcp.f32 %v1015_v6 }
0x1127   :  { %v2019_v7 = vpop.eup %2018 }
0x1128   :  { %v2021_v9 = vpop.eup %2020  ;;  %v1044_v13 = vmul.f32 %v2019_v7, %v2431_v29 }
0x1129   :  { %v1019_v32 = vmul.f32 %v2021_v9, %v2435_v30 }
0x117d   :  { %v1047_v8 = vpop.permute.xlu0 %1046 }
0x117e   :  { %v1049_v34 = vmul.f32 %v2019_v7, %v1047_v8 }
0x1180   :  { %1051 = vrot.lane.b32.xlu0 %v1049_v34, %s2116_s1 }
0x1189   :  { %v1022_v11 = vpop.permute.xlu1 %1021 }
0x118a   :  { %v1024_v12 = vmul.f32 %v2021_v9, %v1022_v11 }
0x118c   :  { %1026 = vrot.lane.b32.xlu1 %v1024_v12, %s2116_s1 }
0x11f2   :  { %v1052_v14 = vpop.permute.xlu0 %1051 }
0x11f3   :  { %v2467_v15 = vadd.f32 %v1052_v14, %v1044_v13 }
0x11f5   :  { %2022 = vtanh.f32 %v2467_v15 }
0x11fe   :  { %v1027_v16 = vpop.permute.xlu1 %1026 }
0x11ff   :  { %v2471_v17 = vadd.f32 %v1027_v16, %v1019_v32 }
0x1201   :  { %2024 = vtanh.f32 %v2471_v17 }
0x1202   :  { %v2023_v18 = vpop.eup %2022 }
0x1203   :  { %1057 = vrot.lane.b32.xlu0 %v2023_v18, %s2116_s1 }
0x120e   :  { %v2025_v24 = vpop.eup %2024 }
0x120f   :  { %1032 = vrot.lane.b32.xlu1 %v2025_v24, %s2116_s1 }
0x1275   :  { %v1058_v25 = vpop.permute.xlu0 %1057 }
0x1276   :  { %v1060_v26 = vmul.f32 %v2019_v7, %v1058_v25 }
0x1278   :  { %v1061_v29 = vpack.c.bf16 %v1060_v26, %v1060_v26 }
0x127a   :  { %1063 = vrot.lane.b32.xlu0 %v1061_v29, %s2118_s2 }
0x1281   :  { %v1033_v27 = vpop.permute.xlu1 %1032 }
0x1282   :  { %v2477_v28 = vmul.f32 %v2021_v9, %v1033_v27 }
0x1284   :  { %v1109_v30 = vpack.c.bf16 %v2477_v28, %v2477_v28 }
0x1286   :  { %1111 = vrot.lane.b32.xlu1 %v1109_v30, %s2118_s2 }
0x12ec   :  { %v1064_v35 = vpop.permute.xlu0 %1063 }
0x12ed   :  { %1768 = vmatmul.mubr.msk.bf16.vlgmr.msra.gmra.mxu1 %vm224_vm1, %v1064_v35 }
0x12ee   :  { %1227 = vmatpush1.bf16.msra.mxu1 %v2222_v21  ;;  %1246 = vmatprep.mubr.bf16.mxu1 %v2117_v20  ;;  %v167_v21 = vadd.f32 %v2255_v33, %v2199_v4 }
0x12ef   :  { %1228 = vmatprep.subr.bf16.mxu1 %v2230_v22 }
0x12f2   :  { %1229 = vmatpush1.bf16.msra.mxu1 %v2236_v23 }
0x12f8   :  { %v1112_v36 = vpop.permute.xlu1 %1111 }
0x12f9   :  { %1877 = vmatmul.mubr.msk.bf16.vlgmr.msra.gmra.mxu0 %vm224_vm1, %v1112_v36 }
0x12fa   :  { %1881 = vmatpush3.bf16.msra.mxu0 %v2281_v0  ;;  %1884 = vmatprep.mubr.msk.bf16.mxu0 %vm2120_vm2, %v2119_v63 }
0x12fb   :  { %1882 = vmatprep.subr.bf16.mxu0 %v2119_v63 }
0x12fe   :  { %1883 = vmatpush3.bf16.msra.mxu0 %v2287_v1 }
0x13ad   :  { %v1102_v20 = vpop.f32.mrf.mxu1 }
0x13ae   :  { %v1182_v38 = vadd.f32 %v1102_v20, %v167_v21 }
0x13af   :  { %v1104_v22 = vpop.f32.mrf.mxu1 }
0x13b0   :  { %2026 = vtanh.f32 %v1182_v38  ;;  %v1771_v4 = vmul.f32 -1.442695, %v1182_v38  ;;  %v1327_v38 = vpack.c.bf16 %v2333_v2, %v2296_v10  ;;  %v1921_v10 = vld [vmem:[%s2731_s6] sm:$0xff]  }
0x13b1   :  { %v1106_v23 = vpop.f32.mrf.mxu1 }
0x13b3   :  { %v1107_v3 = vpop.f32.mrf.mxu1 }
0x13b9   :  { %v1150_v39 = vpop.f32.mrf.mxu0 }
0x13ba   :  { %v1156_v40 = vadd.f32 %v1150_v39, %v1104_v22  ;;  %v1920_v22 = vld [vmem:[%s2731_s6 + $0x8] sm:$0xff]  }
0x13bb   :  { %v1878_v41 = vpop.f32.mrf.mxu0  ;;  %1888 = vmatprep.subr.bf16.mxu1 %v1920_v22 }
0x13bc   :  { %v1157_v43 = vadd.f32 %v2263_v37, %v1156_v40  ;;  %v17_v40 = vstv %s2732_s7 }
0x13bd   :  { %v2027_v0 = vpop.eup %2026  ;;  %v1153_v44 = vpop.f32.mrf.mxu0  ;;  %18 = vst [vmem:[#allocation2] sm:$0x1] %v17_v40 }
0x13be   :  { %1192 = vrot.lane.b32.xlu0 %v2027_v0, %s2116_s1  ;;  %2028 = vtanh.f32 %v1157_v43  ;;  %v1770_v33 = vmul.f32 -1.442695, %v1157_v43 }
0x13bf   :  { %v1879_v63 = vpop.f32.mrf.mxu0  ;;  %2030 = vpow2.f32 %v1771_v4 }
0x13c0   :  { %2032 = vpow2.f32 %v1770_v33 }
0x13cb   :  { %v2029_v1 = vpop.eup %2028 }
0x13cc   :  { %1167 = vrot.lane.b32.xlu1 %v2029_v1, %s2116_s1  ;;  %v2031_v45 = vpop.eup %2030 }
0x13cd   :  { %v1186_v46 = vadd.f32 1.0, %v2031_v45  ;;  %v2033_v47 = vpop.eup %2032 }
0x13ce   :  { %v1161_v19 = vadd.f32 1.0, %v2033_v47 }
0x13cf   :  { %2034 = vrcp.f32 %v1186_v46 }
0x13d0   :  { %2036 = vrcp.f32 %v1161_v19 }
0x13dc   :  { %v2035_v48 = vpop.eup %2034 }
0x13dd   :  { %v2037_v52 = vpop.eup %2036  ;;  %v1190_v55 = vmul.f32 %v2035_v48, %v2467_v15 }
0x13de   :  { %v1165_v59 = vmul.f32 %v2037_v52, %v2471_v17 }
0x1430   :  { %v1193_v50 = vpop.permute.xlu0 %1192 }
0x1431   :  { %v1195_v51 = vmul.f32 %v2035_v48, %v1193_v50 }
0x1433   :  { %1197 = vrot.lane.b32.xlu0 %v1195_v51, %s2116_s1 }
0x143e   :  { %v1168_v53 = vpop.permute.xlu1 %1167 }
0x143f   :  { %v1170_v54 = vmul.f32 %v2037_v52, %v1168_v53 }
0x1441   :  { %1172 = vrot.lane.b32.xlu1 %v1170_v54, %s2116_s1 }
0x14a5   :  { %v1198_v57 = vpop.permute.xlu0 %1197 }
0x14a6   :  { %v1200_v58 = vadd.f32 %v1198_v57, %v1190_v55 }
0x14a8   :  { %2038 = vtanh.f32 %v1200_v58 }
0x14b3   :  { %v1173_v31 = vpop.permute.xlu1 %1172 }
0x14b4   :  { %v1175_v61 = vadd.f32 %v1173_v31, %v1165_v59 }
0x14b5   :  { %v2039_v60 = vpop.eup %2038 }
0x14b6   :  { %1203 = vrot.lane.b32.xlu0 %v2039_v60, %s2116_s1  ;;  %2040 = vtanh.f32 %v1175_v61 }
0x14c3   :  { %v2041_v62 = vpop.eup %2040 }
0x14c4   :  { %1178 = vrot.lane.b32.xlu1 %v2041_v62, %s2116_s1 }
0x1528   :  { %v1204_v5 = vpop.permute.xlu0 %1203 }
0x1529   :  { %v1206_v6 = vmul.f32 %v2035_v48, %v1204_v5 }
0x152b   :  { %v1207_v7 = vpack.c.bf16 %v1206_v6, %v1206_v6 }
0x152d   :  { %1209 = vrot.lane.b32.xlu0 %v1207_v7, %s2118_s2 }
0x1536   :  { %v1179_v8 = vpop.permute.xlu1 %1178 }
0x1537   :  { %v1181_v34 = vmul.f32 %v2037_v52, %v1179_v8 }
0x1539   :  { %v1254_v9 = vpack.c.bf16 %v1181_v34, %v1181_v34 }
0x153b   :  { %1256 = vrot.lane.b32.xlu1 %v1254_v9, %s2118_s2 }
0x159f   :  { %v1210_v11 = vpop.permute.xlu0 %1209 }
0x15a0   :  { %1772 = vmatmul.mubr.msk.bf16.vlgmr.msra.gmra.mxu1 %vm224_vm1, %v1210_v11 }
0x15a1   :  { %1889 = vmatpush3.bf16.msra.mxu1 %v1920_v22 }
0x15a2   :  { %1890 = vmatprep.subr.bf16.mxu1 %v1921_v10 }
0x15a5   :  { %1891 = vmatpush3.bf16.msra.mxu1 %v1921_v10 }
0x15ad   :  { %v1257_v12 = vpop.permute.xlu1 %1256 }
0x15ae   :  { %1885 = vmatmul.mubr.msk.bf16.vlgmr.msra.gmra.mxu0 %vm224_vm1, %v1257_v12 }
0x1660   :  { %v1248_v13 = vpop.f32.mrf.mxu1 }
0x1662   :  { %v1249_v14 = vpop.f32.mrf.mxu1 }
0x1664   :  { %v1251_v15 = vpop.f32.mrf.mxu1 }
0x1666   :  { %v1252_v32 = vpop.f32.mrf.mxu1 }
0x166e   :  { %v1295_v16 = vpop.f32.mrf.mxu0 }
0x166f   :  { %v1301_v17 = vadd.f32 %v1295_v16, %v1249_v14 }
0x1670   :  { %v1886_v18 = vpop.f32.mrf.mxu0 }
0x1671   :  { %v1302_v24 = vadd.f32 %v2263_v37, %v1301_v17  ;;  %v1329_v37 = vpack.c.bf16 %v2477_v28, %v2441_v42  ;;  %v1328_v28 = vpack.c.bf16 %v2405_v49, %v2369_v56  ;;  %v2535_v56 = vld [vmem:[#allocation2] ss:$0 sm:$0xff] }
0x1672   :  { %v1298_v25 = vpop.f32.mrf.mxu0 }
0x1673   :  { %2042 = vtanh.f32 %v1302_v24  ;;  %v1774_v27 = vmul.f32 -1.442695, %v1302_v24 }
0x1674   :  { %v1887_v26 = vpop.f32.mrf.mxu0 }
0x1675   :  { %2044 = vpow2.f32 %v1774_v27 }
0x1680   :  { %v2043_v29 = vpop.eup %2042 }
0x1681   :  { %1312 = vrot.lane.b32.xlu0 %v2043_v29, %s2116_s1 }
0x1682   :  { %v2045_v30 = vpop.eup %2044 }
0x1683   :  { %v1306_v35 = vadd.f32 1.0, %v2045_v30 }
0x1685   :  { %2046 = vrcp.f32 %v1306_v35 }
0x1692   :  { %v2047_v36 = vpop.eup %2046 }
0x1693   :  { %v1310_v23 = vmul.f32 %v2047_v36, %v1175_v61 }
0x16f3   :  { %v1313_v21 = vpop.permute.xlu0 %1312 }
0x16f4   :  { %v1315_v20 = vmul.f32 %v2047_v36, %v1313_v21 }
0x16f6   :  { %1317 = vrot.lane.b32.xlu1 %v1315_v20, %s2116_s1 }
0x16fa   :  { %1346 = vrot.lane.b32.xlu1 %v1327_v38, %s2118_s2 }
0x16fe   :  { %1350 = vrot.lane.b32.xlu1 %v1329_v37, %s2118_s2 }
0x1768   :  { %v1318_v3 = vpop.permute.xlu1 %1317 }
0x1769   :  { %v1320_v39 = vadd.f32 %v1318_v3, %v1310_v23 }
0x176b   :  { %2048 = vtanh.f32 %v1320_v39 }
0x176c   :  { %v1347_v2 = vpop.permute.xlu1 %1346 }
0x176d   :  { %1892 = vmatprep.mubr.msk.bf16.mxu1 %vm224_vm1, %v1347_v2 }
0x1770   :  { %v1351_v63 = vpop.permute.xlu1 %1350 }
0x1778   :  { %v2049_v42 = vpop.eup %2048 }
0x1779   :  { %1323 = vrot.lane.b32.xlu0 %v2049_v42, %s2116_s1 }
0x177d   :  { %1348 = vrot.lane.b32.xlu0 %v1328_v28, %s2118_s2 }
0x17eb   :  { %v1324_v41 = vpop.permute.xlu0 %1323 }
0x17ec   :  { %v1326_v0 = vmul.f32 %v2047_v36, %v1324_v41 }
0x17ee   :  { %v1330_v43 = vpack.c.bf16 %v1326_v0, %v1181_v34 }
0x17ef   :  { %v1349_v44 = vpop.permute.xlu0 %1348 }
0x17f0   :  { %1352 = vrot.lane.b32.xlu0 %v1330_v43, %s2118_s2  ;;  %1893 = vmatmul.mubr.msk.bf16.vlgmr.msra.gmra.mxu1 %vm224_vm1, %v1349_v44 }
0x17f1   :  { %1896 = vmatprep.mubr.msk.bf16.mxu1 %vm224_vm1, %v1351_v63 }
0x1862   :  { %v1353_v1 = vpop.permute.xlu0 %1352 }
0x1863   :  { %1897 = vmatmul.mubr.msk.bf16.gmra.mxu1 %vm224_vm1, %v1353_v1 }
0x18b0   :  { %v1894_v49 = vpop.f32.mrf.mxu1 }
0x18b1   :  { %v2538_v4 = vadd.f32 %v1894_v49, %v2535_v56 }
0x18b2   :  { %v1412_v33 = vpop.f32.mrf.mxu1 }
0x18b3   :  { %v1784_v45 = vmul.f32 -1.442695, %v2538_v4  ;;  %v1501_v46 = vand.u32 2147483647, %v2538_v4  ;;  %v2543_v47 = vadd.f32 %v2535_v56, %v1412_v33  ;;  %v1493_v39 = vmax.f32 %v2538_v4, 0.0 }
0x18b4   :  { %v1895_v19 = vpop.f32.mrf.mxu1 }
0x18b5   :  { %2050 = vpow2.f32 %v1784_v45  ;;  %v1509_v48 = vsub.f32 0.0, %v1501_v46  ;;  %v1782_v50 = vmul.f32 -1.442695, %v2543_v47  ;;  %v1499_v51 = vand.u32 2147483647, %v2543_v47 }
0x18b6   :  { %v2548_v52 = vadd.f32 %v1895_v19, %v2535_v56  ;;  %v1415_v53 = vpop.f32.mrf.mxu1  ;;  %v1491_v38 = vmax.f32 %v2543_v47, 0.0 }
0x18b7   :  { %v1519_v54 = vmul.f32 1.442695, %v1509_v48  ;;  %2052 = vpow2.f32 %v1782_v50  ;;  %v1507_v55 = vsub.f32 0.0, %v1499_v51  ;;  %v2551_v57 = vadd.f32 %v2535_v56, %v1415_v53 }
0x18b8   :  { %v1785_v58 = vmul.f32 -1.442695, %v2548_v52  ;;  %v1502_v59 = vand.u32 2147483647, %v2548_v52  ;;  %v1494_v43 = vmax.f32 %v2548_v52, 0.0 }
0x18b9   :  { %2054 = vpow2.f32 %v1519_v54  ;;  %v1515_v31 = vmul.f32 1.442695, %v1507_v55  ;;  %v1783_v60 = vmul.f32 -1.442695, %v2551_v57  ;;  %v1500_v61 = vand.u32 2147483647, %v2551_v57 }
0x18ba   :  { %2056 = vpow2.f32 %v1785_v58  ;;  %v1510_v62 = vsub.f32 0.0, %v1502_v59  ;;  %v1492_v2 = vmax.f32 %v2551_v57, 0.0 }
0x18bb   :  { %2058 = vpow2.f32 %v1515_v31  ;;  %v1508_v5 = vsub.f32 0.0, %v1500_v61 }
0x18bc   :  { %v1521_v6 = vmul.f32 1.442695, %v1510_v62  ;;  %2060 = vpow2.f32 %v1783_v60 }
0x18bd   :  { %v1517_v7 = vmul.f32 1.442695, %v1508_v5 }
0x18be   :  { %2062 = vpow2.f32 %v1521_v6 }
0x18bf   :  { %2064 = vpow2.f32 %v1517_v7 }
0x18c2   :  { %v2051_v8 = vpop.eup %2050 }
0x18c3   :  { %v1469_v34 = vadd.f32 1.0, %v2051_v8 }
0x18c4   :  { %v2053_v9 = vpop.eup %2052 }
0x18c5   :  { %2066 = vrcp.f32 %v1469_v34  ;;  %v1467_v11 = vadd.f32 1.0, %v2053_v9 }
0x18c6   :  { %v2055_v12 = vpop.eup %2054 }
0x18c7   :  { %v2057_v13 = vpop.eup %2056  ;;  %2068 = vrcp.f32 %v1467_v11  ;;  %v1533_v14 = vadd.f32 1.0, %v2055_v12 }
0x18c8   :  { %v2059_v15 = vpop.eup %2058  ;;  %v1470_v32 = vadd.f32 1.0, %v2057_v13 }
0x18c9   :  { %v2061_v16 = vpop.eup %2060  ;;  %v1531_v17 = vadd.f32 1.0, %v2059_v15  ;;  %2070 = vlog2.f32 %v1533_v14 }
0x18ca   :  { %2072 = vrcp.f32 %v1470_v32  ;;  %v1468_v18 = vadd.f32 1.0, %v2061_v16 }
0x18cb   :  { %v2063_v24 = vpop.eup %2062  ;;  %2074 = vlog2.f32 %v1531_v17 }
0x18cc   :  { %v2065_v25 = vpop.eup %2064  ;;  %2076 = vrcp.f32 %v1468_v18  ;;  %v1534_v26 = vadd.f32 1.0, %v2063_v24 }
0x18cd   :  { %v1532_v29 = vadd.f32 1.0, %v2065_v25 }
0x18ce   :  { %2078 = vlog2.f32 %v1534_v26 }
0x18cf   :  { %2080 = vlog2.f32 %v1532_v29 }
0x18d2   :  { %v2067_v27 = vpop.eup %2066 }
0x18d3   :  { %1713 = vst.msk [vmem:[%s2733_s11 + $0x10] sm:$0xff] %vm1709_vm3, %v2067_v27 }
0x18d4   :  { %v2069_v30 = vpop.eup %2068 }
0x18d5   :  { %1711 = vst.msk [vmem:[%s2733_s11] sm:$0xff] %vm1709_vm3, %v2069_v30 }
0x18d6   :  { %v2071_v35 = vpop.eup %2070 }
0x18d7   :  { %v2073_v36 = vpop.eup %2072  ;;  %v1544_v22 = vmul.f32 0.6931472, %v2071_v35 }
0x18d8   :  { %v2075_v21 = vpop.eup %2074  ;;  %1714 = vst.msk [vmem:[%s2733_s11 + $0x18] sm:$0xff] %vm1709_vm3, %v2073_v36 }
0x18d9   :  { %v2077_v20 = vpop.eup %2076  ;;  %v1540_v37 = vmul.f32 0.6931472, %v2075_v21  ;;  %v2580_v40 = vadd.f32 %v1544_v22, %v1493_v39 }
0x18da   :  { %1712 = vst.msk [vmem:[%s2733_s11 + $0x8] sm:$0xff] %vm1709_vm3, %v2077_v20 }
0x18db   :  { %v2079_v23 = vpop.eup %2078  ;;  %v2574_v3 = vadd.f32 %v1540_v37, %v1491_v38  ;;  %v1573_v63 = vsub.f32 %v2538_v4, %v2580_v40 }
0x18dc   :  { %v2081_v10 = vpop.eup %2080  ;;  %v1546_v41 = vmul.f32 0.6931472, %v2079_v23 }
0x18dd   :  { %v1571_v42 = vsub.f32 %v2543_v47, %v2574_v3  ;;  %v1542_v28 = vmul.f32 0.6931472, %v2081_v10 }
0x18de   :  { %v2590_v1 = vadd.f32 %v1546_v41, %v1494_v43 }
0x18df   :  { %1611 = vrot.lane.b32.xlu1 %v1571_v42, %s2121_s30  ;;  %v2583_v0 = vadd.f32 %v1542_v28, %v1492_v2 }
0x18e0   :  { %v1574_v49 = vsub.f32 %v2548_v52, %v2590_v1 }
0x18e1   :  { %v1572_v44 = vsub.f32 %v2551_v57, %v2583_v0 }
0x18e3   :  { %1613 = vrot.lane.b32.xlu0 %v1572_v44, %s2121_s30  ;;  %1615 = vrot.lane.b32.xlu1 %v1573_v63, %s2121_s30 }
0x18e7   :  { %1617 = vrot.lane.b32.xlu0 %v1574_v49, %s2121_s30 }
0x1923   :  { %v1898_v33 = vpop.f32.mrf.mxu1 }
0x1924   :  { %v2598_v45 = vadd.f32 %v1898_v33, %v2535_v56 }
0x1925   :  { %v1428_v46 = vpop.f32.mrf.mxu1 }
0x1926   :  { %v1788_v47 = vmul.f32 -1.442695, %v2598_v45  ;;  %v1505_v4 = vand.u32 2147483647, %v2598_v45  ;;  %v2603_v19 = vadd.f32 %v2535_v56, %v1428_v46  ;;  %v1497_v10 = vmax.f32 %v2598_v45, 0.0 }
0x1927   :  { %v1899_v48 = vpop.f32.mrf.mxu1 }
0x1928   :  { %2082 = vpow2.f32 %v1788_v47  ;;  %v1513_v50 = vsub.f32 0.0, %v1505_v4  ;;  %v1786_v51 = vmul.f32 -1.442695, %v2603_v19  ;;  %v1503_v52 = vand.u32 2147483647, %v2603_v19 }
0x1929   :  { %v2608_v53 = vadd.f32 %v1899_v48, %v2535_v56  ;;  %v1431_v54 = vpop.f32.mrf.mxu1  ;;  %v1495_v38 = vmax.f32 %v2603_v19, 0.0 }
0x192a   :  { %v1527_v55 = vmul.f32 1.442695, %v1513_v50  ;;  %2084 = vpow2.f32 %v1786_v51  ;;  %v1511_v57 = vsub.f32 0.0, %v1503_v52  ;;  %v2611_v58 = vadd.f32 %v2535_v56, %v1431_v54  ;;  %v1580_v54 = vld [vmem:[%s2734_s8 + $0x8] sm:$0xff] }
0x192b   :  { %v1789_v59 = vmul.f32 -1.442695, %v2608_v53  ;;  %v1506_v31 = vand.u32 2147483647, %v2608_v53  ;;  %v1498_v49 = vmax.f32 %v2608_v53, 0.0 }
0x192c   :  { %2086 = vpow2.f32 %v1527_v55  ;;  %v1523_v60 = vmul.f32 1.442695, %v1511_v57  ;;  %v1787_v61 = vmul.f32 -1.442695, %v2611_v58  ;;  %v1504_v62 = vand.u32 2147483647, %v2611_v58 }
0x192d   :  { %2088 = vpow2.f32 %v1789_v59  ;;  %v1514_v5 = vsub.f32 0.0, %v1506_v31  ;;  %v1496_v42 = vmax.f32 %v2611_v58, 0.0  ;;  %v1583_v31 = vld [vmem:[%s2734_s8 + $0x20] sm:$0xff] }
0x192e   :  { %2090 = vpow2.f32 %v1523_v60  ;;  %v1512_v6 = vsub.f32 0.0, %v1504_v62  ;;  %v1585_v62 = vld [vmem:[%s2734_s8 + $0x30] sm:$0xff] }
0x192f   :  { %v1529_v7 = vmul.f32 1.442695, %v1514_v5  ;;  %2092 = vpow2.f32 %v1787_v61 }
0x1930   :  { %v1525_v8 = vmul.f32 1.442695, %v1512_v6  ;;  %v1584_v6 = vld [vmem:[%s2734_s8 + $0x28] sm:$0xff] }
0x1931   :  { %2094 = vpow2.f32 %v1529_v7 }
0x1932   :  { %2096 = vpow2.f32 %v1525_v8 }
0x1935   :  { %v2083_v56 = vpop.eup %2082 }
0x1936   :  { %v1473_v34 = vadd.f32 1.0, %v2083_v56 }
0x1937   :  { %v2085_v9 = vpop.eup %2084 }
0x1938   :  { %2098 = vrcp.f32 %v1473_v34  ;;  %v1471_v11 = vadd.f32 1.0, %v2085_v9  ;;  %v1563_v34 = vsub.f32 0.0, %v2574_v3  ;;  %v1565_v9 = vsub.f32 0.0, %v2580_v40  ;;  %v1587_v40 = vld [vmem:[%s2735_s9] sm:$0xff] }
0x1939   :  { %v2087_v12 = vpop.eup %2086 }
0x193a   :  { %v2089_v13 = vpop.eup %2088  ;;  %2100 = vrcp.f32 %v1471_v11  ;;  %v1537_v14 = vadd.f32 1.0, %v2087_v12  ;;  %v1564_v11 = vsub.f32 0.0, %v2583_v0 }
0x193b   :  { %v2091_v15 = vpop.eup %2090  ;;  %v1474_v32 = vadd.f32 1.0, %v2089_v13  ;;  %v1586_v13 = vld [vmem:[%s2734_s8 + $0x38] sm:$0xff] }
0x193c   :  { %v2093_v16 = vpop.eup %2092  ;;  %v1535_v17 = vadd.f32 1.0, %v2091_v15  ;;  %2102 = vlog2.f32 %v1537_v14 }
0x193d   :  { %2104 = vrcp.f32 %v1474_v32  ;;  %v1472_v18 = vadd.f32 1.0, %v2093_v16 }
0x193e   :  { %v2095_v24 = vpop.eup %2094  ;;  %2106 = vlog2.f32 %v1535_v17  ;;  %v1596_v17 = vmul.f32 %v1580_v54, %v1564_v11 }
0x193f   :  { %v2097_v25 = vpop.eup %2096  ;;  %2108 = vrcp.f32 %v1472_v18  ;;  %v1538_v26 = vadd.f32 1.0, %v2095_v24  ;;  %v1566_v18 = vsub.f32 0.0, %v2590_v1  ;;  %v1588_v24 = vld [vmem:[%s2735_s9 + $0x8] sm:$0xff]  ;;  %v1590_v1 = vld [vmem:[%s2735_s9 + $0x18] sm:$0xff] }
0x1940   :  { %v1536_v29 = vadd.f32 1.0, %v2097_v25 }
0x1941   :  { %2110 = vlog2.f32 %v1538_v26 }
0x1942   :  { %2112 = vlog2.f32 %v1536_v29 }
0x1945   :  { %v2099_v27 = vpop.eup %2098 }
0x1946   :  { %1717 = vst.msk [vmem:[%s2733_s11 + $0x30] sm:$0xff] %vm1709_vm3, %v2099_v27  ;;  %v1589_v27 = vld [vmem:[%s2735_s9 + $0x10] sm:$0xff] }
0x1947   :  { %v2101_v30 = vpop.eup %2100 }
0x1948   :  { %1715 = vst.msk [vmem:[%s2733_s11 + $0x20] sm:$0xff] %vm1709_vm3, %v2101_v30 }
0x1949   :  { %v2103_v35 = vpop.eup %2102 }
0x194a   :  { %v2105_v36 = vpop.eup %2104  ;;  %v1552_v22 = vmul.f32 0.6931472, %v2103_v35 }
0x194b   :  { %v2107_v21 = vpop.eup %2106  ;;  %1718 = vst.msk [vmem:[%s2733_s11 + $0x38] sm:$0xff] %vm1709_vm3, %v2105_v36 }
0x194c   :  { %v2109_v20 = vpop.eup %2108  ;;  %v1548_v37 = vmul.f32 0.6931472, %v2107_v21  ;;  %v2640_v43 = vadd.f32 %v1552_v22, %v1497_v10 }
0x194d   :  { %1716 = vst.msk [vmem:[%s2733_s11 + $0x28] sm:$0xff] %vm1709_vm3, %v2109_v20 }
0x194e   :  { %v2111_v23 = vpop.eup %2110  ;;  %v2634_v39 = vadd.f32 %v1548_v37, %v1495_v38  ;;  %v1577_v47 = vsub.f32 %v2598_v45, %v2640_v43  ;;  %v1581_v45 = vld [vmem:[%s2734_s8 + $0x10] sm:$0xff] }
0x194f   :  { %v2113_v2 = vpop.eup %2112  ;;  %v1554_v44 = vmul.f32 0.6931472, %v2111_v23  ;;  %v1597_v3 = vmul.f32 %v1581_v45, %v1565_v9 }
0x1950   :  { %v1575_v28 = vsub.f32 %v2603_v19, %v2634_v39  ;;  %v1550_v41 = vmul.f32 0.6931472, %v2113_v2  ;;  %v1579_v19 = vld [vmem:[%s2734_s8] sm:$0xff]  ;;  %v1692_v2 = vadd.f32 %v1588_v24, %v1587_v40 }
0x1951   :  { %v1612_v33 = vpop.permute.xlu1 %1611  ;;  %v2650_v4 = vadd.f32 %v1554_v44, %v1498_v49  ;;  %v1595_v15 = vmul.f32 %v1579_v19, %v1563_v34  ;;  %v1592_v49 = vld [vmem:[%s2735_s9 + $0x28] sm:$0xff] }
0x1952   :  { %1619 = vrot.lane.b32.xlu1 %v1575_v28, %s2121_s30  ;;  %v2643_v63 = vadd.f32 %v1550_v41, %v1496_v42  ;;  %v1635_v50 = vmul.f32 %v1612_v33, %v1579_v19  ;;  %v1694_v42 = vadd.f32 %v1692_v2, %v1589_v27  ;;  %v1591_v41 = vld [vmem:[%s2735_s9 + $0x20] sm:$0xff]  ;;  %v1594_v19 = vld [vmem:[%s2735_s9 + $0x38] sm:$0xff] }
0x1953   :  { %v1578_v51 = vsub.f32 %v2608_v53, %v2650_v4  ;;  %v1582_v53 = vld [vmem:[%s2734_s8 + $0x18] sm:$0xff] }
0x1954   :  { %v1576_v46 = vsub.f32 %v2611_v58, %v2643_v63  ;;  %v1598_v36 = vmul.f32 %v1582_v53, %v1566_v18  ;;  %v1696_v28 = vadd.f32 %v1694_v42, %v1590_v1 }
0x1955   :  { %v1614_v48 = vpop.permute.xlu0 %1613  ;;  %v1616_v52 = vpop.permute.xlu1 %1615 }
0x1956   :  { %1621 = vrot.lane.b32.xlu0 %v1576_v46, %s2121_s30  ;;  %1623 = vrot.lane.b32.xlu1 %v1577_v47, %s2121_s30  ;;  %v1637_v55 = vmul.f32 %v1616_v52, %v1581_v45  ;;  %v1636_v57 = vmul.f32 %v1614_v48, %v1580_v54  ;;  %v1698_v44 = vadd.f32 %v1696_v28, %v1591_v41  ;;  %v1593_v46 = vld [vmem:[%s2735_s9 + $0x30] sm:$0xff]  ;;  %v1569_v45 = vsub.f32 0.0, %v2640_v43 }
0x1957   :  { %v1568_v54 = vsub.f32 0.0, %v2643_v63 }
0x1958   :  { %v1700_v33 = vadd.f32 %v1698_v44, %v1592_v49 }
0x1959   :  { %v1618_v58 = vpop.permute.xlu0 %1617 }
0x195a   :  { %1625 = vrot.lane.b32.xlu0 %v1578_v51, %s2121_s30  ;;  %1651 = vrot.lane.b32.xlu1 %v1635_v50, %s2122_s18  ;;  %v1638_v59 = vmul.f32 %v1618_v58, %v1582_v53  ;;  %v1702_v47 = vadd.f32 %v1700_v33, %v1593_v46  ;;  %v1567_v50 = vsub.f32 0.0, %v2634_v39  ;;  %v1601_v53 = vmul.f32 %v1585_v62, %v1569_v45 }
0x195c   :  { %v1704_v48 = vadd.f32 %v1702_v47, %v1594_v19  ;;  %v1599_v52 = vmul.f32 %v1583_v31, %v1567_v50 }
0x195e   :  { %1655 = vrot.lane.b32.xlu1 %v1637_v55, %s2122_s18  ;;  %1653 = vrot.lane.b32.xlu0 %v1636_v57, %s2122_s18  ;;  %v1705_v51 = vmax.f32 %v1704_v48, 1e-06 }
0x1960   :  { %2114 = vrcp.f32 %v1705_v51 }
0x1962   :  { %1657 = vrot.lane.b32.xlu0 %v1638_v59, %s2122_s18  ;;  %v1600_v59 = vmul.f32 %v1584_v6, %v1568_v54 }
0x19c4   :  { %v1620_v60 = vpop.permute.xlu1 %1619 }
0x19c5   :  { %v1639_v61 = vmul.f32 %v1620_v60, %v1583_v31  ;;  %v1570_v60 = vsub.f32 0.0, %v2650_v4 }
0x19c7   :  { %1659 = vrot.lane.b32.xlu1 %v1639_v61, %s2122_s18  ;;  %v1602_v34 = vmul.f32 %v1586_v13, %v1570_v60 }
0x19c8   :  { %v1624_v5 = vpop.permute.xlu1 %1623  ;;  %v1622_v7 = vpop.permute.xlu0 %1621 }
0x19c9   :  { %v1641_v8 = vmul.f32 %v1624_v5, %v1585_v62  ;;  %v1640_v56 = vmul.f32 %v1622_v7, %v1584_v6 }
0x19cb   :  { %1663 = vrot.lane.b32.xlu1 %v1641_v8, %s2122_s18  ;;  %1661 = vrot.lane.b32.xlu0 %v1640_v56, %s2122_s18 }
0x19cc   :  { %v1652_v12 = vpop.permute.xlu1 %1651  ;;  %v1626_v14 = vpop.permute.xlu0 %1625 }
0x19cd   :  { %v1642_v32 = vmul.f32 %v1626_v14, %v1586_v13  ;;  %v1675_v16 = vadd.f32 %v1652_v12, %v1595_v15  ;;  %v2115_v14 = vpop.eup %2114 }
0x19cf   :  { %1665 = vrot.lane.b32.xlu0 %v1642_v32, %s2122_s18  ;;  %v1683_v30 = vmul.f32 %v1675_v16, %v1587_v40 }
0x19d0   :  { %v1656_v0 = vpop.permute.xlu1 %1655  ;;  %v1654_v25 = vpop.permute.xlu0 %1653 }
0x19d1   :  { %v1677_v26 = vadd.f32 %v1656_v0, %v1597_v3  ;;  %v1676_v29 = vadd.f32 %v1654_v25, %v1596_v17 }
0x19d3   :  { %v1684_v35 = vmul.f32 %v1676_v29, %v1588_v24  ;;  %v1685_v20 = vmul.f32 %v1677_v26, %v1589_v27 }
0x19d4   :  { %v1658_v21 = vpop.permute.xlu0 %1657 }
0x19d5   :  { %v1691_v38 = vadd.f32 %v1684_v35, %v1683_v30  ;;  %v1678_v37 = vadd.f32 %v1658_v21, %v1598_v36 }
0x19d7   :  { %v1693_v22 = vadd.f32 %v1691_v38, %v1685_v20  ;;  %v1686_v23 = vmul.f32 %v1678_v37, %v1590_v1 }
0x19d9   :  { %v1695_v10 = vadd.f32 %v1693_v22, %v1686_v23 }
0x1a39   :  { %v1660_v55 = vpop.permute.xlu1 %1659 }
0x1a3a   :  { %v1679_v57 = vadd.f32 %v1660_v55, %v1599_v52 }
0x1a3c   :  { %v1687_v58 = vmul.f32 %v1679_v57, %v1591_v41 }
0x1a3d   :  { %v1664_v61 = vpop.permute.xlu1 %1663  ;;  %v1662_v5 = vpop.permute.xlu0 %1661 }
0x1a3e   :  { %v1697_v7 = vadd.f32 %v1695_v10, %v1687_v58  ;;  %v1681_v8 = vadd.f32 %v1664_v61, %v1601_v53  ;;  %v1680_v56 = vadd.f32 %v1662_v5, %v1600_v59 }
0x1a40   :  { %v1688_v39 = vmul.f32 %v1680_v56, %v1592_v49  ;;  %v1689_v9 = vmul.f32 %v1681_v8, %v1593_v46 }
0x1a41   :  { %v1666_v31 = vpop.permute.xlu0 %1665 }
0x1a42   :  { %v1699_v43 = vadd.f32 %v1697_v7, %v1688_v39  ;;  %v1682_v11 = vadd.f32 %v1666_v31, %v1602_v34 }
0x1a44   :  { %v1701_v63 = vadd.f32 %v1699_v43, %v1689_v9  ;;  %v1690_v12 = vmul.f32 %v1682_v11, %v1594_v19 }
0x1a46   :  { %v1703_v15 = vadd.f32 %v1701_v63, %v1690_v12 }
0x1a48   :  { %v1707_v32 = vmul.f32 %v2115_v14, %v1703_v15 }
0x1a4a   :  { %v1708_v62 = vsub.f32 0.0, %v1707_v32 }
0x1a4c   :  { %1710 = vst.msk [vmem:[%s2736_s10] sm:$0xff] %vm1709_vm3, %v1708_v62 }

</bundles_post_ra>
